<compile_context>
chip_gen: v7x
topology: tpu7x:2x2x1
jax: 0.10.0
libtpu: 0.0.40
codegen_flags: <defaults>
</compile_context>

<pallas_src>
import functools

import jax
import jax.numpy as jnp
from jax import lax
from jax.experimental import pallas as pl
from jax.experimental.pallas import tpu as pltpu


def _round_up(x, m):
    return ((x + m - 1) // m) * m


@functools.lru_cache(maxsize=1)
def _vmem_limit_bytes():
    """Generation-aware VMEM limit: ~80% of physical per-core capacity."""
    cap = 64 * 1024 * 1024                      # conservative fallback (v7x)
    try:
        cap = int(pltpu.get_tpu_info().vmem_capacity_bytes)
    except Exception:
        pass
    return int(cap * 0.8)


@functools.lru_cache(maxsize=1)
def _gate_dtype():
    """bf16 gate transcendentals on v6e/v7x (native bf16 EUP/VPU); f32 on v5."""
    try:
        kind = jax.devices()[0].device_kind.lower()
    except Exception:
        return jnp.float32
    return jnp.float32 if "v5" in kind else jnp.bfloat16


def _spec_single_buffered(shape, index_map):
    """BlockSpec with a single pipeline buffer (constant index_map inputs)."""
    try:
        return pl.BlockSpec(shape, index_map, pipeline_mode=pl.Buffered(1))
    except TypeError:                            # older BlockSpec signature
        return pl.BlockSpec(shape, index_map)


# ----------------------------------------------------------------------------
# Fused linear kernel:  out = x @ w_t + b     (bf16 matmul, f32 accumulate)
# Used for (a) the hoisted LSTM input projection and (b) the decoder.
# w_t is pre-transposed to (K, V); x is pre-cast to bf16 in the wrapper.
# ----------------------------------------------------------------------------
def _linear_kernel(x_ref, w_ref, b_ref, o_ref):
    acc = jnp.dot(x_ref[...], w_ref[...], preferred_element_type=jnp.float32)
    o_ref[...] = (acc + b_ref[...]).astype(o_ref.dtype)


def linear(x, w_t, b, out_dtype=jnp.float32):
    """x: (N, K), w_t: (K, V) bf16, b: (1, V) f32 -> (N, V) out_dtype."""
    N, K = x.shape
    V = w_t.shape[1]
    x = x.astype(jnp.bfloat16)                   # no-op if already bf16

    # Row tile: weight-stream arithmetic intensity == tn; hold up to 1024 rows
    # per pass so the (K,V) weight is streamed (near-)once.
    tn = 1024 if N >= 1024 else _round_up(N, 8)
    Np = _round_up(N, tn)
    # Col tile: lane-dense multiple of 128.  Pad ragged vocab sizes instead of
    # falling back to a full-dimension (VMEM-busting) weight block.
    tv = 512 if V >= 512 else _round_up(V, 128)
    Vp = _round_up(V, tv)

    if Np != N:
        x = jnp.pad(x, ((0, Np - N), (0, 0)))
    if Vp != V:
        w_t = jnp.pad(w_t, ((0, 0), (0, Vp - V)))
        b = jnp.pad(b, ((0, 0), (0, Vp - V)))

    out = pl.pallas_call(
        _linear_kernel,
        out_shape=jax.ShapeDtypeStruct((Np, Vp), out_dtype),
        grid_spec=pltpu.PrefetchScalarGridSpec(
            num_scalar_prefetch=0,
            grid=(Np // tn, Vp // tv),
            in_specs=[
                pl.BlockSpec((tn, K), lambda i, j: (i, 0)),
                pl.BlockSpec((K, tv), lambda i, j: (0, j)),
                pl.BlockSpec((1, tv), lambda i, j: (0, j)),
            ],
            out_specs=pl.BlockSpec((tn, tv), lambda i, j: (i, j)),
        ),
        compiler_params=pltpu.CompilerParams(
            dimension_semantics=("parallel", "parallel"),
            vmem_limit_bytes=_vmem_limit_bytes()),
    )(x, w_t, b)
    if Np != N or Vp != V:
        out = out[:N, :V]
    return out


# ----------------------------------------------------------------------------
# LSTM recurrence kernel.  The input projection (x @ W_ih + bias) is already
# precomputed as gx = (T, B, 4H) bf16.  Grid = (time_chunks,); each grid step
# runs tile_t timesteps in an unrolled fori_loop; only h @ W_hh is done per
# step.  h/c carry lives in f32 VMEM scratch across the sequential time axis.
# ----------------------------------------------------------------------------
def _make_lstm_rec_kernel(gate_dtype):
    def kernel(gx_ref, h0_ref, c0_ref, whh_ref,
               y_ref, hT_ref, cT_ref,
               h_scr, c_scr):
        tc = pl.program_id(0)

        @pl.when(tc == 0)
        def _():
            h_scr[...] = h0_ref[...]
            c_scr[...] = c0_ref[...]

        whh = whh_ref[...]                  # (H, 4H) bf16, single-buffered
        H = h_scr.shape[1]
        tile_t = gx_ref.shape[0]

        def step(tt, carry):
            h, c = carry                    # f32 (B, H)
            gates = gx_ref[tt].astype(jnp.float32) + jnp.dot(
                h.astype(jnp.bfloat16), whh,
                preferred_element_type=jnp.float32)
            g = gates.astype(gate_dtype)
            # PyTorch gate order: input, forget, cell(g), output.
            # (For production nhid is a multiple of 128 so these slices are
            #  lane-aligned; at toy sizes they are merely correct.)
            i_g = jax.nn.sigmoid(g[:, 0 * H:1 * H]).astype(jnp.float32)
            f_g = jax.nn.sigmoid(g[:, 1 * H:2 * H]).astype(jnp.float32)
            g_g = jnp.tanh(g[:, 2 * H:3 * H]).astype(jnp.float32)
            o_g = jax.nn.sigmoid(g[:, 3 * H:4 * H]).astype(jnp.float32)
            c_new = f_g * c + i_g * g_g     # cell update kept in f32 (no drift)
            h_new = o_g * jnp.tanh(c_new)
            y_ref[tt] = h_new.astype(y_ref.dtype)
            return (h_new, c_new)

        h, c = lax.fori_loop(0, tile_t, step, (h_scr[...], c_scr[...]),
                             unroll=True)
        h_scr[...] = h
        c_scr[...] = c

        @pl.when(tc == pl.num_programs(0) - 1)
        def _():
            hT_ref[...] = h
            cT_ref[...] = c

    return kernel


def _choose_tile_t(T, B, H, budget_bytes):
    """Largest divisor of T whose recurrence VMEM working set fits the budget."""
    bf16, f32 = 2, 4
    fixed = (H * 4 * H * bf16            # W_hh (single-buffered)
             + 2 * B * H * f32           # h0, c0 (single-buffered)
             + 2 * 2 * B * H * f32       # hT, cT output blocks
             + 2 * B * H * f32)          # h/c scratch
    per_t = 2 * (B * 4 * H * bf16 + B * H * bf16)   # gx + y, double-buffered
    cands = sorted({c for c in (T, 128, 64, 32, 16, 8, 4, 2, 1)
                    if 1 <= c <= T and T % c == 0}, reverse=True)
    for c in cands:
        if fixed + c * per_t <= budget_bytes:
            return c
    return 1


def lstm_layer(x, h0, c0, w_ih_t, w_hh_t, bias):
    """One LSTM layer over the full sequence.

    x: (T, B, I) bf16; w_ih_t: (I, 4H) bf16; w_hh_t: (H, 4H) bf16;
    bias: (1, 4H) f32 (= b_ih + b_hh).
    Returns y (T,B,H) bf16, h_T (B,H) f32, c_T (B,H) f32.
    """
    T, B, I = x.shape
    H = h0.shape[1]

    # (1) Hoisted input projection: one big MXU GEMM over all T*B rows,
    #     emitted in bf16 (the largest HBM stream of the whole model).
    gx = linear(x.reshape(T * B, I), w_ih_t, bias,
                out_dtype=jnp.bfloat16).reshape(T, B, 4 * H)

    # (2) Recurrence: chunk timesteps, chunk size from the VMEM budget.
    tile_t = _choose_tile_t(T, B, H, int(_vmem_limit_bytes() * 0.75))

    y, hT, cT = pl.pallas_call(
        _make_lstm_rec_kernel(_gate_dtype()),
        out_shape=(jax.ShapeDtypeStruct((T, B, H), jnp.bfloat16),
                   jax.ShapeDtypeStruct((B, H), jnp.float32),
                   jax.ShapeDtypeStruct((B, H), jnp.float32)),
        grid_spec=pltpu.PrefetchScalarGridSpec(
            num_scalar_prefetch=0,
            grid=(T // tile_t,),
            in_specs=[
                pl.BlockSpec((tile_t, B, 4 * H), lambda t: (t, 0, 0)),   # gx
                _spec_single_buffered((B, H), lambda t: (0, 0)),         # h0
                _spec_single_buffered((B, H), lambda t: (0, 0)),         # c0
                _spec_single_buffered((H, 4 * H), lambda t: (0, 0)),     # W_hh^T
            ],
            out_specs=[
                pl.BlockSpec((tile_t, B, H), lambda t: (t, 0, 0)),       # y
                pl.BlockSpec((B, H), lambda t: (0, 0)),                  # h_T
                pl.BlockSpec((B, H), lambda t: (0, 0)),                  # c_T
            ],
            scratch_shapes=[pltpu.VMEM((B, H), jnp.float32),             # h carry
                            pltpu.VMEM((B, H), jnp.float32)],            # c carry
        ),
        compiler_params=pltpu.CompilerParams(
            dimension_semantics=("arbitrary",),
            vmem_limit_bytes=_vmem_limit_bytes()),
    )(gx, h0, c0, w_hh_t)
    return y, hT, cT


# ----------------------------------------------------------------------------
# Parameters & full model forward
# ----------------------------------------------------------------------------
def init_params(key, ntoken, ninp, nhid, nlayers):
    initrange = 0.1
    k_enc, k_dec, k_rnn = jax.random.split(key, 3)
    params = {
        "enc_w": jax.random.uniform(k_enc, (ntoken, ninp), jnp.float32,
                                    -initrange, initrange),
        # decoder weight pre-transposed to (H, V) and stored in bf16
        "dec_w_t": jax.random.uniform(k_dec, (ntoken, nhid), jnp.float32,
                                      -initrange, initrange).T
                                     .astype(jnp.bfloat16),
        "dec_b": jnp.zeros((1, ntoken), jnp.float32),
        "layers": [],
    }
    stdv = 1.0 / (nhid ** 0.5)  # PyTorch default LSTM init
    for layer in range(nlayers):
        in_size = ninp if layer == 0 else nhid
        k_rnn, k1, k2, k3, k4 = jax.random.split(k_rnn, 5)
        w_ih = jax.random.uniform(k1, (4 * nhid, in_size), jnp.float32, -stdv, stdv)
        w_hh = jax.random.uniform(k2, (4 * nhid, nhid), jnp.float32, -stdv, stdv)
        b_ih = jax.random.uniform(k3, (4 * nhid,), jnp.float32, -stdv, stdv)
        b_hh = jax.random.uniform(k4, (4 * nhid,), jnp.float32, -stdv, stdv)
        params["layers"].append({
            "w_ih_t": w_ih.T.astype(jnp.bfloat16),   # (I, 4H)
            "w_hh_t": w_hh.T.astype(jnp.bfloat16),   # (H, 4H)
            "bias": (b_ih + b_hh)[None, :],          # (1, 4H) f32
        })
    return params


@jax.jit
def rnn_model_forward(params, tokens, hidden):
    """tokens: (T, B) int32; hidden = (h0, c0), each (nlayers, B, nhid)."""
    h0_all, c0_all = hidden
    # Embedding lookup (glue); dropout = identity (eval mode).
    # Single cast to bf16 so every downstream GEMM streams bf16 activations.
    emb = jnp.take(params["enc_w"], tokens, axis=0).astype(jnp.bfloat16)

    x = emb
    h_T, c_T = [], []
    for layer_idx, lp in enumerate(params["layers"]):
        x, hT, cT = lstm_layer(x, h0_all[layer_idx], c0_all[layer_idx],
                               lp["w_ih_t"], lp["w_hh_t"], lp["bias"])
        h_T.append(hT)
        c_T.append(cT)
        # inter-layer dropout: identity (eval mode)
    output = x                                                 # (T, B, H) bf16

    T, B, H = output.shape
    decoded = linear(output.reshape(T * B, H),
                     params["dec_w_t"], params["dec_b"],
                     out_dtype=jnp.float32)                    # (T*B, ntoken)
    decoded = decoded.reshape(T, B, -1)
    return decoded, (jnp.stack(h_T, axis=0), jnp.stack(c_T, axis=0))


if __name__ == "__main__":
    ntoken, ninp, nhid, nlayers = 32, 32, 32, 2
    T, B = 8, 4

    key = jax.random.PRNGKey(0)
    k_param, k_tok = jax.random.split(key)
    params = init_params(k_param, ntoken, ninp, nhid, nlayers)

    tokens = jax.random.randint(k_tok, (T, B), 0, ntoken, dtype=jnp.int32)
    h0 = jnp.zeros((nlayers, B, nhid), jnp.float32)
    c0 = jnp.zeros((nlayers, B, nhid), jnp.float32)

    decoded, (hT, cT) = rnn_model_forward(params, tokens, (h0, c0))
    jax.block_until_ready((decoded, hT, cT))

    assert decoded.shape == (T, B, ntoken)
    assert hT.shape == (nlayers, B, nhid) and cT.shape == (nlayers, B, nhid)
    assert bool(jnp.all(jnp.isfinite(decoded)))
    print("KERNEL_OK")
</pallas_src>

<mosaic_0001>
module attributes {stable_mosaic.version = 11 : i64} {
  func.func @_linear_kernel(%arg0: i32, %arg1: i32, %arg2: memref<32x32xbf16, #tpu.memory_space<vmem>>, %arg3: memref<32x128xbf16, #tpu.memory_space<vmem>>, %arg4: memref<1x128xf32, #tpu.memory_space<vmem>>, %arg5: memref<32x128xbf16, #tpu.memory_space<vmem>>) attributes {dimension_semantics = [#tpu.dimension_semantics<parallel>, #tpu.dimension_semantics<parallel>], iteration_bounds = array<i64: 1, 1>, scalar_prefetch = 0 : i64, scratch_operands = 0 : i64, tpu.core_type = #tpu.core_type<tc>, window_params = [{transform_indices = @transform_0, window_bounds = array<i64: 32, 32>}, {transform_indices = @transform_1, window_bounds = array<i64: 32, 128>}, {transform_indices = @transform_2, window_bounds = array<i64: 1, 128>}, {transform_indices = @transform_3, window_bounds = array<i64: 32, 128>}]} {
    %c0 = arith.constant 0 : index
    %c0_0 = arith.constant 0 : index
    %0 = vector.load %arg2[%c0, %c0_0] : memref<32x32xbf16, #tpu.memory_space<vmem>>, vector<32x32xbf16>
    %c0_1 = arith.constant 0 : index
    %c0_2 = arith.constant 0 : index
    %1 = vector.load %arg3[%c0_1, %c0_2] : memref<32x128xbf16, #tpu.memory_space<vmem>>, vector<32x128xbf16>
    %cst = arith.constant dense<0.000000e+00> : vector<32x128xf32>
    %2 = tpu.matmul %0, %1, %cst {dimension_numbers = #tpu.dot_dimension_numbers<[1], [0], [0], [1], [0, 0, 1, 1], [], []>} : vector<32x32xbf16>, vector<32x128xbf16>, vector<32x128xf32> -> vector<32x128xf32>
    %c0_3 = arith.constant 0 : index
    %c0_4 = arith.constant 0 : index
    %3 = vector.load %arg4[%c0_3, %c0_4] : memref<1x128xf32, #tpu.memory_space<vmem>>, vector<1x128xf32>
    %4 = vector.broadcast %3 : vector<1x128xf32> to vector<32x128xf32>
    %5 = arith.addf %2, %4 : vector<32x128xf32>
    %6 = arith.truncf %5 : vector<32x128xf32> to vector<32x128xbf16>
    %c0_5 = arith.constant 0 : index
    %c0_6 = arith.constant 0 : index
    %7 = vector.load %arg5[%c0_5, %c0_6] : memref<32x128xbf16, #tpu.memory_space<vmem>>, vector<32x128xbf16>
    tpu.vector_store %arg5[%c0_5, %c0_6], %6 {strides = array<i32>} : memref<32x128xbf16, #tpu.memory_space<vmem>>, vector<32x128xbf16>,
    return
  }
  func.func @transform_0(%arg0: i32, %arg1: i32) -> (i32, i32) {
    %c0_i32 = arith.constant 0 : i32
    %c0_i32_0 = arith.constant 0 : i32
    return %arg0, %c0_i32 : i32, i32
  }
  func.func @transform_1(%arg0: i32, %arg1: i32) -> (i32, i32) {
    %c0_i32 = arith.constant 0 : i32
    %c0_i32_0 = arith.constant 0 : i32
    return %c0_i32, %arg1 : i32, i32
  }
  func.func @transform_2(%arg0: i32, %arg1: i32) -> (i32, i32) {
    %c0_i32 = arith.constant 0 : i32
    %c0_i32_0 = arith.constant 0 : i32
    return %c0_i32, %arg1 : i32, i32
  }
  func.func @transform_3(%arg0: i32, %arg1: i32) -> (i32, i32) {
    %c0_i32 = arith.constant 0 : i32
    return %arg0, %arg1 : i32, i32
  }
}

module attributes {stable_mosaic.version = 11 : i64} {
  func.func @_linear_kernel(%arg0: i32, %arg1: i32, %arg2: memref<32x32xbf16, #tpu.memory_space<vmem>>, %arg3: memref<32x128xbf16, #tpu.memory_space<vmem>>, %arg4: memref<1x128xf32, #tpu.memory_space<vmem>>, %arg5: memref<32x128xf32, #tpu.memory_space<vmem>>) attributes {dimension_semantics = [#tpu.dimension_semantics<parallel>, #tpu.dimension_semantics<parallel>], iteration_bounds = array<i64: 1, 1>, scalar_prefetch = 0 : i64, scratch_operands = 0 : i64, tpu.core_type = #tpu.core_type<tc>, window_params = [{transform_indices = @transform_0, window_bounds = array<i64: 32, 32>}, {transform_indices = @transform_1, window_bounds = array<i64: 32, 128>}, {transform_indices = @transform_2, window_bounds = array<i64: 1, 128>}, {transform_indices = @transform_3, window_bounds = array<i64: 32, 128>}]} {
    %c0 = arith.constant 0 : index
    %c0_0 = arith.constant 0 : index
    %0 = vector.load %arg2[%c0, %c0_0] : memref<32x32xbf16, #tpu.memory_space<vmem>>, vector<32x32xbf16>
    %c0_1 = arith.constant 0 : index
    %c0_2 = arith.constant 0 : index
    %1 = vector.load %arg3[%c0_1, %c0_2] : memref<32x128xbf16, #tpu.memory_space<vmem>>, vector<32x128xbf16>
    %cst = arith.constant dense<0.000000e+00> : vector<32x128xf32>
    %2 = tpu.matmul %0, %1, %cst {dimension_numbers = #tpu.dot_dimension_numbers<[1], [0], [0], [1], [0, 0, 1, 1], [], []>} : vector<32x32xbf16>, vector<32x128xbf16>, vector<32x128xf32> -> vector<32x128xf32>
    %c0_3 = arith.constant 0 : index
    %c0_4 = arith.constant 0 : index
    %3 = vector.load %arg4[%c0_3, %c0_4] : memref<1x128xf32, #tpu.memory_space<vmem>>, vector<1x128xf32>
    %4 = vector.broadcast %3 : vector<1x128xf32> to vector<32x128xf32>
    %5 = arith.addf %2, %4 : vector<32x128xf32>
    %c0_5 = arith.constant 0 : index
    %c0_6 = arith.constant 0 : index
    %6 = vector.load %arg5[%c0_5, %c0_6] : memref<32x128xf32, #tpu.memory_space<vmem>>, vector<32x128xf32>
    tpu.vector_store %arg5[%c0_5, %c0_6], %5 {strides = array<i32>} : memref<32x128xf32, #tpu.memory_space<vmem>>, vector<32x128xf32>,
    return
  }
  func.func @transform_0(%arg0: i32, %arg1: i32) -> (i32, i32) {
    %c0_i32 = arith.constant 0 : i32
    %c0_i32_0 = arith.constant 0 : i32
    return %arg0, %c0_i32 : i32, i32
  }
  func.func @transform_1(%arg0: i32, %arg1: i32) -> (i32, i32) {
    %c0_i32 = arith.constant 0 : i32
    %c0_i32_0 = arith.constant 0 : i32
    return %c0_i32, %arg1 : i32, i32
  }
  func.func @transform_2(%arg0: i32, %arg1: i32) -> (i32, i32) {
    %c0_i32 = arith.constant 0 : i32
    %c0_i32_0 = arith.constant 0 : i32
    return %c0_i32, %arg1 : i32, i32
  }
  func.func @transform_3(%arg0: i32, %arg1: i32) -> (i32, i32) {
    %c0_i32 = arith.constant 0 : i32
    return %arg0, %arg1 : i32, i32
  }
}

module attributes {stable_mosaic.version = 11 : i64} {
  func.func @kernel(%arg0: i32, %arg1: memref<8x4x128xbf16, #tpu.memory_space<vmem>>, %arg2: memref<4x32xf32, #tpu.memory_space<vmem>>, %arg3: memref<4x32xf32, #tpu.memory_space<vmem>>, %arg4: memref<32x128xbf16, #tpu.memory_space<vmem>>, %arg5: memref<8x4x32xbf16, #tpu.memory_space<vmem>>, %arg6: memref<4x32xf32, #tpu.memory_space<vmem>>, %arg7: memref<4x32xf32, #tpu.memory_space<vmem>>, %arg8: memref<4x32xf32, #tpu.memory_space<vmem>>, %arg9: memref<4x32xf32, #tpu.memory_space<vmem>>) attributes {dimension_semantics = [#tpu.dimension_semantics<arbitrary>], iteration_bounds = array<i64: 1>, scalar_prefetch = 0 : i64, scratch_operands = 2 : i64, tpu.core_type = #tpu.core_type<tc>, window_params = [{transform_indices = @transform_0, window_bounds = array<i64: 8, 4, 128>}, {pipeline_mode = #tpu.pipeline_mode<synchronous>, transform_indices = @transform_1, window_bounds = array<i64: 4, 32>}, {pipeline_mode = #tpu.pipeline_mode<synchronous>, transform_indices = @transform_2, window_bounds = array<i64: 4, 32>}, {pipeline_mode = #tpu.pipeline_mode<synchronous>, transform_indices = @transform_3, window_bounds = array<i64: 32, 128>}, {transform_indices = @transform_4, window_bounds = array<i64: 8, 4, 32>}, {pipeline_mode = #tpu.pipeline_mode<synchronous>, transform_indices = @transform_5, window_bounds = array<i64: 4, 32>}, {pipeline_mode = #tpu.pipeline_mode<synchronous>, transform_indices = @transform_6, window_bounds = array<i64: 4, 32>}]} {
    %c0_i32 = arith.constant 0 : i32
    %0 = arith.cmpi eq, %arg0, %c0_i32 : i32
    %1 = arith.extui %0 : i1 to i32
    %c0_i32_0 = arith.constant 0 : i32
    %2 = arith.cmpi ne, %1, %c0_i32_0 : i32
    scf.if %2 {
      %c0_76 = arith.constant 0 : index
      %c0_77 = arith.constant 0 : index
      %347 = vector.load %arg2[%c0_76, %c0_77] : memref<4x32xf32, #tpu.memory_space<vmem>>, vector<4x32xf32>
      %c0_78 = arith.constant 0 : index
      %c0_79 = arith.constant 0 : index
      %348 = vector.load %arg8[%c0_78, %c0_79] : memref<4x32xf32, #tpu.memory_space<vmem>>, vector<4x32xf32>
      tpu.vector_store %arg8[%c0_78, %c0_79], %347 {strides = array<i32>} : memref<4x32xf32, #tpu.memory_space<vmem>>, vector<4x32xf32>,
      %c0_80 = arith.constant 0 : index
      %c0_81 = arith.constant 0 : index
      %349 = vector.load %arg3[%c0_80, %c0_81] : memref<4x32xf32, #tpu.memory_space<vmem>>, vector<4x32xf32>
      %c0_82 = arith.constant 0 : index
      %c0_83 = arith.constant 0 : index
      %350 = vector.load %arg9[%c0_82, %c0_83] : memref<4x32xf32, #tpu.memory_space<vmem>>, vector<4x32xf32>
      tpu.vector_store %arg9[%c0_82, %c0_83], %349 {strides = array<i32>} : memref<4x32xf32, #tpu.memory_space<vmem>>, vector<4x32xf32>,
    } else {
    }
    %c0 = arith.constant 0 : index
    %c0_1 = arith.constant 0 : index
    %3 = vector.load %arg4[%c0, %c0_1] : memref<32x128xbf16, #tpu.memory_space<vmem>>, vector<32x128xbf16>
    %c0_2 = arith.constant 0 : index
    %c0_3 = arith.constant 0 : index
    %4 = vector.load %arg8[%c0_2, %c0_3] : memref<4x32xf32, #tpu.memory_space<vmem>>, vector<4x32xf32>
    %c0_4 = arith.constant 0 : index
    %c0_5 = arith.constant 0 : index
    %5 = vector.load %arg9[%c0_4, %c0_5] : memref<4x32xf32, #tpu.memory_space<vmem>>, vector<4x32xf32>
    %c0_i32_6 = arith.constant 0 : i32
    %6 = arith.index_cast %c0_i32_6 : i32 to index
    %c0_7 = arith.constant 0 : index
    %c0_8 = arith.constant 0 : index
    %7 = vector.load %arg1[%6, %c0_7, %c0_8] : memref<8x4x128xbf16, #tpu.memory_space<vmem>>, vector<1x4x128xbf16>
    %8 = vector.shape_cast %7 : vector<1x4x128xbf16> to vector<4x128xbf16>
    %9 = arith.extf %8 : vector<4x128xbf16> to vector<4x128xf32>
    %10 = arith.truncf %4 : vector<4x32xf32> to vector<4x32xbf16>
    %cst = arith.constant dense<0.000000e+00> : vector<4x128xf32>
    %11 = tpu.matmul %10, %3, %cst {dimension_numbers = #tpu.dot_dimension_numbers<[1], [0], [0], [1], [0, 0, 1, 1], [], []>} : vector<4x32xbf16>, vector<32x128xbf16>, vector<4x128xf32> -> vector<4x128xf32>
    %12 = arith.addf %9, %11 : vector<4x128xf32>
    %13 = arith.truncf %12 : vector<4x128xf32> to vector<4x128xbf16>
    %14 = vector.extract_strided_slice %13 {offsets = [0, 0], sizes = [4, 32], strides = [1, 1]} : vector<4x128xbf16> to vector<4x32xbf16>
    %15 = arith.negf %14 : vector<4x32xbf16>
    %16 = math.exp %15 : vector<4x32xbf16>
    %cst_9 = arith.constant 1.000000e+00 : bf16
    %17 = vector.broadcast %cst_9 : bf16 to vector<4x32xbf16>
    %18 = arith.addf %17, %16 : vector<4x32xbf16>
    %19 = arith.divf %17, %18 : vector<4x32xbf16>
    %20 = arith.extf %19 : vector<4x32xbf16> to vector<4x32xf32>
    %21 = vector.extract_strided_slice %13 {offsets = [0, 32], sizes = [4, 32], strides = [1, 1]} : vector<4x128xbf16> to vector<4x32xbf16>
    %22 = arith.negf %21 : vector<4x32xbf16>
    %23 = math.exp %22 : vector<4x32xbf16>
    %cst_10 = arith.constant 1.000000e+00 : bf16
    %24 = vector.broadcast %cst_10 : bf16 to vector<4x32xbf16>
    %25 = arith.addf %24, %23 : vector<4x32xbf16>
    %26 = arith.divf %24, %25 : vector<4x32xbf16>
    %27 = arith.extf %26 : vector<4x32xbf16> to vector<4x32xf32>
    %28 = vector.extract_strided_slice %13 {offsets = [0, 64], sizes = [4, 32], strides = [1, 1]} : vector<4x128xbf16> to vector<4x32xbf16>
    %29 = math.tanh %28 : vector<4x32xbf16>
    %30 = arith.extf %29 : vector<4x32xbf16> to vector<4x32xf32>
    %31 = vector.extract_strided_slice %13 {offsets = [0, 96], sizes = [4, 32], strides = [1, 1]} : vector<4x128xbf16> to vector<4x32xbf16>
    %32 = arith.negf %31 : vector<4x32xbf16>
    %33 = math.exp %32 : vector<4x32xbf16>
    %cst_11 = arith.constant 1.000000e+00 : bf16
    %34 = vector.broadcast %cst_11 : bf16 to vector<4x32xbf16>
    %35 = arith.addf %34, %33 : vector<4x32xbf16>
    %36 = arith.divf %34, %35 : vector<4x32xbf16>
    %37 = arith.extf %36 : vector<4x32xbf16> to vector<4x32xf32>
    %38 = arith.mulf %27, %5 : vector<4x32xf32>
    %39 = arith.mulf %20, %30 : vector<4x32xf32>
    %40 = arith.addf %38, %39 : vector<4x32xf32>
    %41 = math.tanh %40 : vector<4x32xf32>
    %42 = arith.mulf %37, %41 : vector<4x32xf32>
    %43 = arith.truncf %42 : vector<4x32xf32> to vector<4x32xbf16>
    %44 = arith.index_cast %c0_i32_6 : i32 to index
    %c0_12 = arith.constant 0 : index
    %c0_13 = arith.constant 0 : index
    %45 = vector.load %arg5[%44, %c0_12, %c0_13] : memref<8x4x32xbf16, #tpu.memory_space<vmem>>, vector<1x4x32xbf16>
    %46 = vector.shape_cast %45 : vector<1x4x32xbf16> to vector<4x32xbf16>
    %47 = vector.shape_cast %43 : vector<4x32xbf16> to vector<1x4x32xbf16>
    tpu.vector_store %arg5[%44, %c0_12, %c0_13], %47 {strides = array<i32>} : memref<8x4x32xbf16, #tpu.memory_space<vmem>>, vector<1x4x32xbf16>,
    %c1_i32 = arith.constant 1 : i32
    %48 = arith.index_cast %c1_i32 : i32 to index
    %c0_14 = arith.constant 0 : index
    %c0_15 = arith.constant 0 : index
    %49 = vector.load %arg1[%48, %c0_14, %c0_15] : memref<8x4x128xbf16, #tpu.memory_space<vmem>>, vector<1x4x128xbf16>
    %50 = vector.shape_cast %49 : vector<1x4x128xbf16> to vector<4x128xbf16>
    %51 = arith.extf %50 : vector<4x128xbf16> to vector<4x128xf32>
    %52 = arith.truncf %42 : vector<4x32xf32> to vector<4x32xbf16>
    %cst_16 = arith.constant dense<0.000000e+00> : vector<4x128xf32>
    %53 = tpu.matmul %52, %3, %cst_16 {dimension_numbers = #tpu.dot_dimension_numbers<[1], [0], [0], [1], [0, 0, 1, 1], [], []>} : vector<4x32xbf16>, vector<32x128xbf16>, vector<4x128xf32> -> vector<4x128xf32>
    %54 = arith.addf %51, %53 : vector<4x128xf32>
    %55 = arith.truncf %54 : vector<4x128xf32> to vector<4x128xbf16>
    %56 = vector.extract_strided_slice %55 {offsets = [0, 0], sizes = [4, 32], strides = [1, 1]} : vector<4x128xbf16> to vector<4x32xbf16>
    %57 = arith.negf %56 : vector<4x32xbf16>
    %58 = math.exp %57 : vector<4x32xbf16>
    %cst_17 = arith.constant 1.000000e+00 : bf16
    %59 = vector.broadcast %cst_17 : bf16 to vector<4x32xbf16>
    %60 = arith.addf %59, %58 : vector<4x32xbf16>
    %61 = arith.divf %59, %60 : vector<4x32xbf16>
    %62 = arith.extf %61 : vector<4x32xbf16> to vector<4x32xf32>
    %63 = vector.extract_strided_slice %55 {offsets = [0, 32], sizes = [4, 32], strides = [1, 1]} : vector<4x128xbf16> to vector<4x32xbf16>
    %64 = arith.negf %63 : vector<4x32xbf16>
    %65 = math.exp %64 : vector<4x32xbf16>
    %cst_18 = arith.constant 1.000000e+00 : bf16
    %66 = vector.broadcast %cst_18 : bf16 to vector<4x32xbf16>
    %67 = arith.addf %66, %65 : vector<4x32xbf16>
    %68 = arith.divf %66, %67 : vector<4x32xbf16>
    %69 = arith.extf %68 : vector<4x32xbf16> to vector<4x32xf32>
    %70 = vector.extract_strided_slice %55 {offsets = [0, 64], sizes = [4, 32], strides = [1, 1]} : vector<4x128xbf16> to vector<4x32xbf16>
    %71 = math.tanh %70 : vector<4x32xbf16>
    %72 = arith.extf %71 : vector<4x32xbf16> to vector<4x32xf32>
    %73 = vector.extract_strided_slice %55 {offsets = [0, 96], sizes = [4, 32], strides = [1, 1]} : vector<4x128xbf16> to vector<4x32xbf16>
    %74 = arith.negf %73 : vector<4x32xbf16>
    %75 = math.exp %74 : vector<4x32xbf16>
    %cst_19 = arith.constant 1.000000e+00 : bf16
    %76 = vector.broadcast %cst_19 : bf16 to vector<4x32xbf16>
    %77 = arith.addf %76, %75 : vector<4x32xbf16>
    %78 = arith.divf %76, %77 : vector<4x32xbf16>
    %79 = arith.extf %78 : vector<4x32xbf16> to vector<4x32xf32>
    %80 = arith.mulf %69, %40 : vector<4x32xf32>
    %81 = arith.mulf %62, %72 : vector<4x32xf32>
    %82 = arith.addf %80, %81 : vector<4x32xf32>
    %83 = math.tanh %82 : vector<4x32xf32>
    %84 = arith.mulf %79, %83 : vector<4x32xf32>
    %85 = arith.truncf %84 : vector<4x32xf32> to vector<4x32xbf16>
    %86 = arith.index_cast %c1_i32 : i32 to index
    %c0_20 = arith.constant 0 : index
    %c0_21 = arith.constant 0 : index
    %87 = vector.load %arg5[%86, %c0_20, %c0_21] : memref<8x4x32xbf16, #tpu.memory_space<vmem>>, vector<1x4x32xbf16>
    %88 = vector.shape_cast %87 : vector<1x4x32xbf16> to vector<4x32xbf16>
    %89 = vector.shape_cast %85 : vector<4x32xbf16> to vector<1x4x32xbf16>
    tpu.vector_store %arg5[%86, %c0_20, %c0_21], %89 {strides = array<i32>} : memref<8x4x32xbf16, #tpu.memory_space<vmem>>, vector<1x4x32xbf16>,
    %c2_i32 = arith.constant 2 : i32
    %90 = arith.index_cast %c2_i32 : i32 to index
    %c0_22 = arith.constant 0 : index
    %c0_23 = arith.constant 0 : index
    %91 = vector.load %arg1[%90, %c0_22, %c0_23] : memref<8x4x128xbf16, #tpu.memory_space<vmem>>, vector<1x4x128xbf16>
    %92 = vector.shape_cast %91 : vector<1x4x128xbf16> to vector<4x128xbf16>
    %93 = arith.extf %92 : vector<4x128xbf16> to vector<4x128xf32>
    %94 = arith.truncf %84 : vector<4x32xf32> to vector<4x32xbf16>
    %cst_24 = arith.constant dense<0.000000e+00> : vector<4x128xf32>
    %95 = tpu.matmul %94, %3, %cst_24 {dimension_numbers = #tpu.dot_dimension_numbers<[1], [0], [0], [1], [0, 0, 1, 1], [], []>} : vector<4x32xbf16>, vector<32x128xbf16>, vector<4x128xf32> -> vector<4x128xf32>
    %96 = arith.addf %93, %95 : vector<4x128xf32>
    %97 = arith.truncf %96 : vector<4x128xf32> to vector<4x128xbf16>
    %98 = vector.extract_strided_slice %97 {offsets = [0, 0], sizes = [4, 32], strides = [1, 1]} : vector<4x128xbf16> to vector<4x32xbf16>
    %99 = arith.negf %98 : vector<4x32xbf16>
    %100 = math.exp %99 : vector<4x32xbf16>
    %cst_25 = arith.constant 1.000000e+00 : bf16
    %101 = vector.broadcast %cst_25 : bf16 to vector<4x32xbf16>
    %102 = arith.addf %101, %100 : vector<4x32xbf16>
    %103 = arith.divf %101, %102 : vector<4x32xbf16>
    %104 = arith.extf %103 : vector<4x32xbf16> to vector<4x32xf32>
    %105 = vector.extract_strided_slice %97 {offsets = [0, 32], sizes = [4, 32], strides = [1, 1]} : vector<4x128xbf16> to vector<4x32xbf16>
    %106 = arith.negf %105 : vector<4x32xbf16>
    %107 = math.exp %106 : vector<4x32xbf16>
    %cst_26 = arith.constant 1.000000e+00 : bf16
    %108 = vector.broadcast %cst_26 : bf16 to vector<4x32xbf16>
    %109 = arith.addf %108, %107 : vector<4x32xbf16>
    %110 = arith.divf %108, %109 : vector<4x32xbf16>
    %111 = arith.extf %110 : vector<4x32xbf16> to vector<4x32xf32>
    %112 = vector.extract_strided_slice %97 {offsets = [0, 64], sizes = [4, 32], strides = [1, 1]} : vector<4x128xbf16> to vector<4x32xbf16>
    %113 = math.tanh %112 : vector<4x32xbf16>
    %114 = arith.extf %113 : vector<4x32xbf16> to vector<4x32xf32>
    %115 = vector.extract_strided_slice %97 {offsets = [0, 96], sizes = [4, 32], strides = [1, 1]} : vector<4x128xbf16> to vector<4x32xbf16>
    %116 = arith.negf %115 : vector<4x32xbf16>
    %117 = math.exp %116 : vector<4x32xbf16>
    %cst_27 = arith.constant 1.000000e+00 : bf16
    %118 = vector.broadcast %cst_27 : bf16 to vector<4x32xbf16>
    %119 = arith.addf %118, %117 : vector<4x32xbf16>
    %120 = arith.divf %118, %119 : vector<4x32xbf16>
    %121 = arith.extf %120 : vector<4x32xbf16> to vector<4x32xf32>
    %122 = arith.mulf %111, %82 : vector<4x32xf32>
    %123 = arith.mulf %104, %114 : vector<4x32xf32>
    %124 = arith.addf %122, %123 : vector<4x32xf32>
    %125 = math.tanh %124 : vector<4x32xf32>
    %126 = arith.mulf %121, %125 : vector<4x32xf32>
    %127 = arith.truncf %126 : vector<4x32xf32> to vector<4x32xbf16>
    %128 = arith.index_cast %c2_i32 : i32 to index
    %c0_28 = arith.constant 0 : index
    %c0_29 = arith.constant 0 : index
    %129 = vector.load %arg5[%128, %c0_28, %c0_29] : memref<8x4x32xbf16, #tpu.memory_space<vmem>>, vector<1x4x32xbf16>
    %130 = vector.shape_cast %129 : vector<1x4x32xbf16> to vector<4x32xbf16>
    %131 = vector.shape_cast %127 : vector<4x32xbf16> to vector<1x4x32xbf16>
    tpu.vector_store %arg5[%128, %c0_28, %c0_29], %131 {strides = array<i32>} : memref<8x4x32xbf16, #tpu.memory_space<vmem>>, vector<1x4x32xbf16>,
    %c3_i32 = arith.constant 3 : i32
    %132 = arith.index_cast %c3_i32 : i32 to index
    %c0_30 = arith.constant 0 : index
    %c0_31 = arith.constant 0 : index
    %133 = vector.load %arg1[%132, %c0_30, %c0_31] : memref<8x4x128xbf16, #tpu.memory_space<vmem>>, vector<1x4x128xbf16>
    %134 = vector.shape_cast %133 : vector<1x4x128xbf16> to vector<4x128xbf16>
    %135 = arith.extf %134 : vector<4x128xbf16> to vector<4x128xf32>
    %136 = arith.truncf %126 : vector<4x32xf32> to vector<4x32xbf16>
    %cst_32 = arith.constant dense<0.000000e+00> : vector<4x128xf32>
    %137 = tpu.matmul %136, %3, %cst_32 {dimension_numbers = #tpu.dot_dimension_numbers<[1], [0], [0], [1], [0, 0, 1, 1], [], []>} : vector<4x32xbf16>, vector<32x128xbf16>, vector<4x128xf32> -> vector<4x128xf32>
    %138 = arith.addf %135, %137 : vector<4x128xf32>
    %139 = arith.truncf %138 : vector<4x128xf32> to vector<4x128xbf16>
    %140 = vector.extract_strided_slice %139 {offsets = [0, 0], sizes = [4, 32], strides = [1, 1]} : vector<4x128xbf16> to vector<4x32xbf16>
    %141 = arith.negf %140 : vector<4x32xbf16>
    %142 = math.exp %141 : vector<4x32xbf16>
    %cst_33 = arith.constant 1.000000e+00 : bf16
    %143 = vector.broadcast %cst_33 : bf16 to vector<4x32xbf16>
    %144 = arith.addf %143, %142 : vector<4x32xbf16>
    %145 = arith.divf %143, %144 : vector<4x32xbf16>
    %146 = arith.extf %145 : vector<4x32xbf16> to vector<4x32xf32>
    %147 = vector.extract_strided_slice %139 {offsets = [0, 32], sizes = [4, 32], strides = [1, 1]} : vector<4x128xbf16> to vector<4x32xbf16>
    %148 = arith.negf %147 : vector<4x32xbf16>
    %149 = math.exp %148 : vector<4x32xbf16>
    %cst_34 = arith.constant 1.000000e+00 : bf16
    %150 = vector.broadcast %cst_34 : bf16 to vector<4x32xbf16>
    %151 = arith.addf %150, %149 : vector<4x32xbf16>
    %152 = arith.divf %150, %151 : vector<4x32xbf16>
    %153 = arith.extf %152 : vector<4x32xbf16> to vector<4x32xf32>
    %154 = vector.extract_strided_slice %139 {offsets = [0, 64], sizes = [4, 32], strides = [1, 1]} : vector<4x128xbf16> to vector<4x32xbf16>
    %155 = math.tanh %154 : vector<4x32xbf16>
    %156 = arith.extf %155 : vector<4x32xbf16> to vector<4x32xf32>
    %157 = vector.extract_strided_slice %139 {offsets = [0, 96], sizes = [4, 32], strides = [1, 1]} : vector<4x128xbf16> to vector<4x32xbf16>
    %158 = arith.negf %157 : vector<4x32xbf16>
    %159 = math.exp %158 : vector<4x32xbf16>
    %cst_35 = arith.constant 1.000000e+00 : bf16
    %160 = vector.broadcast %cst_35 : bf16 to vector<4x32xbf16>
    %161 = arith.addf %160, %159 : vector<4x32xbf16>
    %162 = arith.divf %160, %161 : vector<4x32xbf16>
    %163 = arith.extf %162 : vector<4x32xbf16> to vector<4x32xf32>
    %164 = arith.mulf %153, %124 : vector<4x32xf32>
    %165 = arith.mulf %146, %156 : vector<4x32xf32>
    %166 = arith.addf %164, %165 : vector<4x32xf32>
    %167 = math.tanh %166 : vector<4x32xf32>
    %168 = arith.mulf %163, %167 : vector<4x32xf32>
    %169 = arith.truncf %168 : vector<4x32xf32> to vector<4x32xbf16>
    %170 = arith.index_cast %c3_i32 : i32 to index
    %c0_36 = arith.constant 0 : index
    %c0_37 = arith.constant 0 : index
    %171 = vector.load %arg5[%170, %c0_36, %c0_37] : memref<8x4x32xbf16, #tpu.memory_space<vmem>>, vector<1x4x32xbf16>
    %172 = vector.shape_cast %171 : vector<1x4x32xbf16> to vector<4x32xbf16>
    %173 = vector.shape_cast %169 : vector<4x32xbf16> to vector<1x4x32xbf16>
    tpu.vector_store %arg5[%170, %c0_36, %c0_37], %173 {strides = array<i32>} : memref<8x4x32xbf16, #tpu.memory_space<vmem>>, vector<1x4x32xbf16>,
    %c4_i32 = arith.constant 4 : i32
    %174 = arith.index_cast %c4_i32 : i32 to index
    %c0_38 = arith.constant 0 : index
    %c0_39 = arith.constant 0 : index
    %175 = vector.load %arg1[%174, %c0_38, %c0_39] : memref<8x4x128xbf16, #tpu.memory_space<vmem>>, vector<1x4x128xbf16>
    %176 = vector.shape_cast %175 : vector<1x4x128xbf16> to vector<4x128xbf16>
    %177 = arith.extf %176 : vector<4x128xbf16> to vector<4x128xf32>
    %178 = arith.truncf %168 : vector<4x32xf32> to vector<4x32xbf16>
    %cst_40 = arith.constant dense<0.000000e+00> : vector<4x128xf32>
    %179 = tpu.matmul %178, %3, %cst_40 {dimension_numbers = #tpu.dot_dimension_numbers<[1], [0], [0], [1], [0, 0, 1, 1], [], []>} : vector<4x32xbf16>, vector<32x128xbf16>, vector<4x128xf32> -> vector<4x128xf32>
    %180 = arith.addf %177, %179 : vector<4x128xf32>
    %181 = arith.truncf %180 : vector<4x128xf32> to vector<4x128xbf16>
    %182 = vector.extract_strided_slice %181 {offsets = [0, 0], sizes = [4, 32], strides = [1, 1]} : vector<4x128xbf16> to vector<4x32xbf16>
    %183 = arith.negf %182 : vector<4x32xbf16>
    %184 = math.exp %183 : vector<4x32xbf16>
    %cst_41 = arith.constant 1.000000e+00 : bf16
    %185 = vector.broadcast %cst_41 : bf16 to vector<4x32xbf16>
    %186 = arith.addf %185, %184 : vector<4x32xbf16>
    %187 = arith.divf %185, %186 : vector<4x32xbf16>
    %188 = arith.extf %187 : vector<4x32xbf16> to vector<4x32xf32>
    %189 = vector.extract_strided_slice %181 {offsets = [0, 32], sizes = [4, 32], strides = [1, 1]} : vector<4x128xbf16> to vector<4x32xbf16>
    %190 = arith.negf %189 : vector<4x32xbf16>
    %191 = math.exp %190 : vector<4x32xbf16>
    %cst_42 = arith.constant 1.000000e+00 : bf16
    %192 = vector.broadcast %cst_42 : bf16 to vector<4x32xbf16>
    %193 = arith.addf %192, %191 : vector<4x32xbf16>
    %194 = arith.divf %192, %193 : vector<4x32xbf16>
    %195 = arith.extf %194 : vector<4x32xbf16> to vector<4x32xf32>
    %196 = vector.extract_strided_slice %181 {offsets = [0, 64], sizes = [4, 32], strides = [1, 1]} : vector<4x128xbf16> to vector<4x32xbf16>
    %197 = math.tanh %196 : vector<4x32xbf16>
    %198 = arith.extf %197 : vector<4x32xbf16> to vector<4x32xf32>
    %199 = vector.extract_strided_slice %181 {offsets = [0, 96], sizes = [4, 32], strides = [1, 1]} : vector<4x128xbf16> to vector<4x32xbf16>
    %200 = arith.negf %199 : vector<4x32xbf16>
    %201 = math.exp %200 : vector<4x32xbf16>
    %cst_43 = arith.constant 1.000000e+00 : bf16
    %202 = vector.broadcast %cst_43 : bf16 to vector<4x32xbf16>
    %203 = arith.addf %202, %201 : vector<4x32xbf16>
    %204 = arith.divf %202, %203 : vector<4x32xbf16>
    %205 = arith.extf %204 : vector<4x32xbf16> to vector<4x32xf32>
    %206 = arith.mulf %195, %166 : vector<4x32xf32>
    %207 = arith.mulf %188, %198 : vector<4x32xf32>
    %208 = arith.addf %206, %207 : vector<4x32xf32>
    %209 = math.tanh %208 : vector<4x32xf32>
    %210 = arith.mulf %205, %209 : vector<4x32xf32>
    %211 = arith.truncf %210 : vector<4x32xf32> to vector<4x32xbf16>
    %212 = arith.index_cast %c4_i32 : i32 to index
    %c0_44 = arith.constant 0 : index
    %c0_45 = arith.constant 0 : index
    %213 = vector.load %arg5[%212, %c0_44, %c0_45] : memref<8x4x32xbf16, #tpu.memory_space<vmem>>, vector<1x4x32xbf16>
    %214 = vector.shape_cast %213 : vector<1x4x32xbf16> to vector<4x32xbf16>
    %215 = vector.shape_cast %211 : vector<4x32xbf16> to vector<1x4x32xbf16>
    tpu.vector_store %arg5[%212, %c0_44, %c0_45], %215 {strides = array<i32>} : memref<8x4x32xbf16, #tpu.memory_space<vmem>>, vector<1x4x32xbf16>,
    %c5_i32 = arith.constant 5 : i32
    %216 = arith.index_cast %c5_i32 : i32 to index
    %c0_46 = arith.constant 0 : index
    %c0_47 = arith.constant 0 : index
    %217 = vector.load %arg1[%216, %c0_46, %c0_47] : memref<8x4x128xbf16, #tpu.memory_space<vmem>>, vector<1x4x128xbf16>
    %218 = vector.shape_cast %217 : vector<1x4x128xbf16> to vector<4x128xbf16>
    %219 = arith.extf %218 : vector<4x128xbf16> to vector<4x128xf32>
    %220 = arith.truncf %210 : vector<4x32xf32> to vector<4x32xbf16>
    %cst_48 = arith.constant dense<0.000000e+00> : vector<4x128xf32>
    %221 = tpu.matmul %220, %3, %cst_48 {dimension_numbers = #tpu.dot_dimension_numbers<[1], [0], [0], [1], [0, 0, 1, 1], [], []>} : vector<4x32xbf16>, vector<32x128xbf16>, vector<4x128xf32> -> vector<4x128xf32>
    %222 = arith.addf %219, %221 : vector<4x128xf32>
    %223 = arith.truncf %222 : vector<4x128xf32> to vector<4x128xbf16>
    %224 = vector.extract_strided_slice %223 {offsets = [0, 0], sizes = [4, 32], strides = [1, 1]} : vector<4x128xbf16> to vector<4x32xbf16>
    %225 = arith.negf %224 : vector<4x32xbf16>
    %226 = math.exp %225 : vector<4x32xbf16>
    %cst_49 = arith.constant 1.000000e+00 : bf16
    %227 = vector.broadcast %cst_49 : bf16 to vector<4x32xbf16>
    %228 = arith.addf %227, %226 : vector<4x32xbf16>
    %229 = arith.divf %227, %228 : vector<4x32xbf16>
    %230 = arith.extf %229 : vector<4x32xbf16> to vector<4x32xf32>
    %231 = vector.extract_strided_slice %223 {offsets = [0, 32], sizes = [4, 32], strides = [1, 1]} : vector<4x128xbf16> to vector<4x32xbf16>
    %232 = arith.negf %231 : vector<4x32xbf16>
    %233 = math.exp %232 : vector<4x32xbf16>
    %cst_50 = arith.constant 1.000000e+00 : bf16
    %234 = vector.broadcast %cst_50 : bf16 to vector<4x32xbf16>
    %235 = arith.addf %234, %233 : vector<4x32xbf16>
    %236 = arith.divf %234, %235 : vector<4x32xbf16>
    %237 = arith.extf %236 : vector<4x32xbf16> to vector<4x32xf32>
    %238 = vector.extract_strided_slice %223 {offsets = [0, 64], sizes = [4, 32], strides = [1, 1]} : vector<4x128xbf16> to vector<4x32xbf16>
    %239 = math.tanh %238 : vector<4x32xbf16>
    %240 = arith.extf %239 : vector<4x32xbf16> to vector<4x32xf32>
    %241 = vector.extract_strided_slice %223 {offsets = [0, 96], sizes = [4, 32], strides = [1, 1]} : vector<4x128xbf16> to vector<4x32xbf16>
    %242 = arith.negf %241 : vector<4x32xbf16>
    %243 = math.exp %242 : vector<4x32xbf16>
    %cst_51 = arith.constant 1.000000e+00 : bf16
    %244 = vector.broadcast %cst_51 : bf16 to vector<4x32xbf16>
    %245 = arith.addf %244, %243 : vector<4x32xbf16>
    %246 = arith.divf %244, %245 : vector<4x32xbf16>
    %247 = arith.extf %246 : vector<4x32xbf16> to vector<4x32xf32>
    %248 = arith.mulf %237, %208 : vector<4x32xf32>
    %249 = arith.mulf %230, %240 : vector<4x32xf32>
    %250 = arith.addf %248, %249 : vector<4x32xf32>
    %251 = math.tanh %250 : vector<4x32xf32>
    %252 = arith.mulf %247, %251 : vector<4x32xf32>
    %253 = arith.truncf %252 : vector<4x32xf32> to vector<4x32xbf16>
    %254 = arith.index_cast %c5_i32 : i32 to index
    %c0_52 = arith.constant 0 : index
    %c0_53 = arith.constant 0 : index
    %255 = vector.load %arg5[%254, %c0_52, %c0_53] : memref<8x4x32xbf16, #tpu.memory_space<vmem>>, vector<1x4x32xbf16>
    %256 = vector.shape_cast %255 : vector<1x4x32xbf16> to vector<4x32xbf16>
    %257 = vector.shape_cast %253 : vector<4x32xbf16> to vector<1x4x32xbf16>
    tpu.vector_store %arg5[%254, %c0_52, %c0_53], %257 {strides = array<i32>} : memref<8x4x32xbf16, #tpu.memory_space<vmem>>, vector<1x4x32xbf16>,
    %c6_i32 = arith.constant 6 : i32
    %258 = arith.index_cast %c6_i32 : i32 to index
    %c0_54 = arith.constant 0 : index
    %c0_55 = arith.constant 0 : index
    %259 = vector.load %arg1[%258, %c0_54, %c0_55] : memref<8x4x128xbf16, #tpu.memory_space<vmem>>, vector<1x4x128xbf16>
    %260 = vector.shape_cast %259 : vector<1x4x128xbf16> to vector<4x128xbf16>
    %261 = arith.extf %260 : vector<4x128xbf16> to vector<4x128xf32>
    %262 = arith.truncf %252 : vector<4x32xf32> to vector<4x32xbf16>
    %cst_56 = arith.constant dense<0.000000e+00> : vector<4x128xf32>
    %263 = tpu.matmul %262, %3, %cst_56 {dimension_numbers = #tpu.dot_dimension_numbers<[1], [0], [0], [1], [0, 0, 1, 1], [], []>} : vector<4x32xbf16>, vector<32x128xbf16>, vector<4x128xf32> -> vector<4x128xf32>
    %264 = arith.addf %261, %263 : vector<4x128xf32>
    %265 = arith.truncf %264 : vector<4x128xf32> to vector<4x128xbf16>
    %266 = vector.extract_strided_slice %265 {offsets = [0, 0], sizes = [4, 32], strides = [1, 1]} : vector<4x128xbf16> to vector<4x32xbf16>
    %267 = arith.negf %266 : vector<4x32xbf16>
    %268 = math.exp %267 : vector<4x32xbf16>
    %cst_57 = arith.constant 1.000000e+00 : bf16
    %269 = vector.broadcast %cst_57 : bf16 to vector<4x32xbf16>
    %270 = arith.addf %269, %268 : vector<4x32xbf16>
    %271 = arith.divf %269, %270 : vector<4x32xbf16>
    %272 = arith.extf %271 : vector<4x32xbf16> to vector<4x32xf32>
    %273 = vector.extract_strided_slice %265 {offsets = [0, 32], sizes = [4, 32], strides = [1, 1]} : vector<4x128xbf16> to vector<4x32xbf16>
    %274 = arith.negf %273 : vector<4x32xbf16>
    %275 = math.exp %274 : vector<4x32xbf16>
    %cst_58 = arith.constant 1.000000e+00 : bf16
    %276 = vector.broadcast %cst_58 : bf16 to vector<4x32xbf16>
    %277 = arith.addf %276, %275 : vector<4x32xbf16>
    %278 = arith.divf %276, %277 : vector<4x32xbf16>
    %279 = arith.extf %278 : vector<4x32xbf16> to vector<4x32xf32>
    %280 = vector.extract_strided_slice %265 {offsets = [0, 64], sizes = [4, 32], strides = [1, 1]} : vector<4x128xbf16> to vector<4x32xbf16>
    %281 = math.tanh %280 : vector<4x32xbf16>
    %282 = arith.extf %281 : vector<4x32xbf16> to vector<4x32xf32>
    %283 = vector.extract_strided_slice %265 {offsets = [0, 96], sizes = [4, 32], strides = [1, 1]} : vector<4x128xbf16> to vector<4x32xbf16>
    %284 = arith.negf %283 : vector<4x32xbf16>
    %285 = math.exp %284 : vector<4x32xbf16>
    %cst_59 = arith.constant 1.000000e+00 : bf16
    %286 = vector.broadcast %cst_59 : bf16 to vector<4x32xbf16>
    %287 = arith.addf %286, %285 : vector<4x32xbf16>
    %288 = arith.divf %286, %287 : vector<4x32xbf16>
    %289 = arith.extf %288 : vector<4x32xbf16> to vector<4x32xf32>
    %290 = arith.mulf %279, %250 : vector<4x32xf32>
    %291 = arith.mulf %272, %282 : vector<4x32xf32>
    %292 = arith.addf %290, %291 : vector<4x32xf32>
    %293 = math.tanh %292 : vector<4x32xf32>
    %294 = arith.mulf %289, %293 : vector<4x32xf32>
    %295 = arith.truncf %294 : vector<4x32xf32> to vector<4x32xbf16>
    %296 = arith.index_cast %c6_i32 : i32 to index
    %c0_60 = arith.constant 0 : index
    %c0_61 = arith.constant 0 : index
    %297 = vector.load %arg5[%296, %c0_60, %c0_61] : memref<8x4x32xbf16, #tpu.memory_space<vmem>>, vector<1x4x32xbf16>
    %298 = vector.shape_cast %297 : vector<1x4x32xbf16> to vector<4x32xbf16>
    %299 = vector.shape_cast %295 : vector<4x32xbf16> to vector<1x4x32xbf16>
    tpu.vector_store %arg5[%296, %c0_60, %c0_61], %299 {strides = array<i32>} : memref<8x4x32xbf16, #tpu.memory_space<vmem>>, vector<1x4x32xbf16>,
    %c7_i32 = arith.constant 7 : i32
    %300 = arith.index_cast %c7_i32 : i32 to index
    %c0_62 = arith.constant 0 : index
    %c0_63 = arith.constant 0 : index
    %301 = vector.load %arg1[%300, %c0_62, %c0_63] : memref<8x4x128xbf16, #tpu.memory_space<vmem>>, vector<1x4x128xbf16>
    %302 = vector.shape_cast %301 : vector<1x4x128xbf16> to vector<4x128xbf16>
    %303 = arith.extf %302 : vector<4x128xbf16> to vector<4x128xf32>
    %304 = arith.truncf %294 : vector<4x32xf32> to vector<4x32xbf16>
    %cst_64 = arith.constant dense<0.000000e+00> : vector<4x128xf32>
    %305 = tpu.matmul %304, %3, %cst_64 {dimension_numbers = #tpu.dot_dimension_numbers<[1], [0], [0], [1], [0, 0, 1, 1], [], []>} : vector<4x32xbf16>, vector<32x128xbf16>, vector<4x128xf32> -> vector<4x128xf32>
    %306 = arith.addf %303, %305 : vector<4x128xf32>
    %307 = arith.truncf %306 : vector<4x128xf32> to vector<4x128xbf16>
    %308 = vector.extract_strided_slice %307 {offsets = [0, 0], sizes = [4, 32], strides = [1, 1]} : vector<4x128xbf16> to vector<4x32xbf16>
    %309 = arith.negf %308 : vector<4x32xbf16>
    %310 = math.exp %309 : vector<4x32xbf16>
    %cst_65 = arith.constant 1.000000e+00 : bf16
    %311 = vector.broadcast %cst_65 : bf16 to vector<4x32xbf16>
    %312 = arith.addf %311, %310 : vector<4x32xbf16>
    %313 = arith.divf %311, %312 : vector<4x32xbf16>
    %314 = arith.extf %313 : vector<4x32xbf16> to vector<4x32xf32>
    %315 = vector.extract_strided_slice %307 {offsets = [0, 32], sizes = [4, 32], strides = [1, 1]} : vector<4x128xbf16> to vector<4x32xbf16>
    %316 = arith.negf %315 : vector<4x32xbf16>
    %317 = math.exp %316 : vector<4x32xbf16>
    %cst_66 = arith.constant 1.000000e+00 : bf16
    %318 = vector.broadcast %cst_66 : bf16 to vector<4x32xbf16>
    %319 = arith.addf %318, %317 : vector<4x32xbf16>
    %320 = arith.divf %318, %319 : vector<4x32xbf16>
    %321 = arith.extf %320 : vector<4x32xbf16> to vector<4x32xf32>
    %322 = vector.extract_strided_slice %307 {offsets = [0, 64], sizes = [4, 32], strides = [1, 1]} : vector<4x128xbf16> to vector<4x32xbf16>
    %323 = math.tanh %322 : vector<4x32xbf16>
    %324 = arith.extf %323 : vector<4x32xbf16> to vector<4x32xf32>
    %325 = vector.extract_strided_slice %307 {offsets = [0, 96], sizes = [4, 32], strides = [1, 1]} : vector<4x128xbf16> to vector<4x32xbf16>
    %326 = arith.negf %325 : vector<4x32xbf16>
    %327 = math.exp %326 : vector<4x32xbf16>
    %cst_67 = arith.constant 1.000000e+00 : bf16
    %328 = vector.broadcast %cst_67 : bf16 to vector<4x32xbf16>
    %329 = arith.addf %328, %327 : vector<4x32xbf16>
    %330 = arith.divf %328, %329 : vector<4x32xbf16>
    %331 = arith.extf %330 : vector<4x32xbf16> to vector<4x32xf32>
    %332 = arith.mulf %321, %292 : vector<4x32xf32>
    %333 = arith.mulf %314, %324 : vector<4x32xf32>
    %334 = arith.addf %332, %333 : vector<4x32xf32>
    %335 = math.tanh %334 : vector<4x32xf32>
    %336 = arith.mulf %331, %335 : vector<4x32xf32>
    %337 = arith.truncf %336 : vector<4x32xf32> to vector<4x32xbf16>
    %338 = arith.index_cast %c7_i32 : i32 to index
    %c0_68 = arith.constant 0 : index
    %c0_69 = arith.constant 0 : index
    %339 = vector.load %arg5[%338, %c0_68, %c0_69] : memref<8x4x32xbf16, #tpu.memory_space<vmem>>, vector<1x4x32xbf16>
    %340 = vector.shape_cast %339 : vector<1x4x32xbf16> to vector<4x32xbf16>
    %341 = vector.shape_cast %337 : vector<4x32xbf16> to vector<1x4x32xbf16>
    tpu.vector_store %arg5[%338, %c0_68, %c0_69], %341 {strides = array<i32>} : memref<8x4x32xbf16, #tpu.memory_space<vmem>>, vector<1x4x32xbf16>,
    %c8_i32 = arith.constant 8 : i32
    %c0_70 = arith.constant 0 : index
    %c0_71 = arith.constant 0 : index
    %342 = vector.load %arg8[%c0_70, %c0_71] : memref<4x32xf32, #tpu.memory_space<vmem>>, vector<4x32xf32>
    tpu.vector_store %arg8[%c0_70, %c0_71], %336 {strides = array<i32>} : memref<4x32xf32, #tpu.memory_space<vmem>>, vector<4x32xf32>,
    %c0_72 = arith.constant 0 : index
    %c0_73 = arith.constant 0 : index
    %343 = vector.load %arg9[%c0_72, %c0_73] : memref<4x32xf32, #tpu.memory_space<vmem>>, vector<4x32xf32>
    tpu.vector_store %arg9[%c0_72, %c0_73], %334 {strides = array<i32>} : memref<4x32xf32, #tpu.memory_space<vmem>>, vector<4x32xf32>,
    %c0_i32_74 = arith.constant 0 : i32
    %344 = arith.cmpi eq, %arg0, %c0_i32_74 : i32
    %345 = arith.extui %344 : i1 to i32
    %c0_i32_75 = arith.constant 0 : i32
    %346 = arith.cmpi ne, %345, %c0_i32_75 : i32
    scf.if %346 {
      %c0_76 = arith.constant 0 : index
      %c0_77 = arith.constant 0 : index
      %347 = vector.load %arg6[%c0_76, %c0_77] : memref<4x32xf32, #tpu.memory_space<vmem>>, vector<4x32xf32>
      tpu.vector_store %arg6[%c0_76, %c0_77], %336 {strides = array<i32>} : memref<4x32xf32, #tpu.memory_space<vmem>>, vector<4x32xf32>,
      %c0_78 = arith.constant 0 : index
      %c0_79 = arith.constant 0 : index
      %348 = vector.load %arg7[%c0_78, %c0_79] : memref<4x32xf32, #tpu.memory_space<vmem>>, vector<4x32xf32>
      tpu.vector_store %arg7[%c0_78, %c0_79], %334 {strides = array<i32>} : memref<4x32xf32, #tpu.memory_space<vmem>>, vector<4x32xf32>,
    } else {
    }
    return
  }
  func.func @transform_0(%arg0: i32) -> (i32, i32, i32) {
    %c0_i32 = arith.constant 0 : i32
    %c0_i32_0 = arith.constant 0 : i32
    %c0_i32_1 = arith.constant 0 : i32
    return %arg0, %c0_i32, %c0_i32_0 : i32, i32, i32
  }
  func.func @transform_1(%arg0: i32) -> (i32, i32) {
    %c0_i32 = arith.constant 0 : i32
    %c0_i32_0 = arith.constant 0 : i32
    %c0_i32_1 = arith.constant 0 : i32
    return %c0_i32, %c0_i32_0 : i32, i32
  }
  func.func @transform_2(%arg0: i32) -> (i32, i32) {
    %c0_i32 = arith.constant 0 : i32
    %c0_i32_0 = arith.constant 0 : i32
    %c0_i32_1 = arith.constant 0 : i32
    return %c0_i32, %c0_i32_0 : i32, i32
  }
  func.func @transform_3(%arg0: i32) -> (i32, i32) {
    %c0_i32 = arith.constant 0 : i32
    %c0_i32_0 = arith.constant 0 : i32
    %c0_i32_1 = arith.constant 0 : i32
    return %c0_i32, %c0_i32_0 : i32, i32
  }
  func.func @transform_4(%arg0: i32) -> (i32, i32, i32) {
    %c0_i32 = arith.constant 0 : i32
    %c0_i32_0 = arith.constant 0 : i32
    %c0_i32_1 = arith.constant 0 : i32
    return %arg0, %c0_i32, %c0_i32_0 : i32, i32, i32
  }
  func.func @transform_5(%arg0: i32) -> (i32, i32) {
    %c0_i32 = arith.constant 0 : i32
    %c0_i32_0 = arith.constant 0 : i32
    %c0_i32_1 = arith.constant 0 : i32
    return %c0_i32, %c0_i32_0 : i32, i32
  }
  func.func @transform_6(%arg0: i32) -> (i32, i32) {
    %c0_i32 = arith.constant 0 : i32
    %c0_i32_0 = arith.constant 0 : i32
    %c0_i32_1 = arith.constant 0 : i32
    return %c0_i32, %c0_i32_0 : i32, i32
  }
}

</mosaic_0001>

<bundles_post_ra>
// kernel: rnn_model_forward.5
= control target key start
LH: loop header
LB: loop body
LE: loop exit
PB: predicated region body
PF: predicated region fallthrough
CT: control target
= control target key end

     0   :  { %vm52_vm0 = vcmask 261120   ;;  %s215_s1 = inlined_call_operand.vmem [shape: bf16[32,128], index: 1, kind: input, shape index: {}]   ;;  %s216_s0 = inlined_call_operand.vmem [shape: bf16[32,32], index: 0, kind: input, shape index: {}]   ;;  %s217_s2 = inlined_call_operand.vmem [shape: f32[1,128], index: 2, kind: input, shape index: {}]   ;;  %s218_s3 = inlined_call_operand.vmem [shape: bf16[32,128], index: 3, kind: output, shape index: {}]  }
   0x1   :  { %v170_v0 = vld [vmem:[%s215_s1] sm:$0xff]   ;;  %v171_v1 = vld [vmem:[%s215_s1 + $0x8] sm:$0xff]  }
   0x2   :  { %162 = vmatprep.subr.bf16.mxu0 %v170_v0  ;;  %v172_v2 = vld [vmem:[%s216_s0] sm:$0xff]   ;;  %v173_v3 = vld [vmem:[%s216_s0 + $0x8] sm:$0xff]  }
   0x3   :  { %163 = vmatpush3.bf16.msra.mxu0 %v170_v0  ;;  %166 = vmatprep.mubr.msk.bf16.mxu0 %vm52_vm0, %v172_v2  ;;  %v132_v5 = vld [vmem:[%s217_s2] ss:$0 sm:$0xff] }
   0x4   :  { %164 = vmatprep.subr.bf16.mxu0 %v171_v1 }
   0x7   :  { %165 = vmatpush3.bf16.msra.mxu0 %v171_v1 }
   0xa   :  { %167 = vmatmul.mubr.msk.bf16.vlgmr.msra.gmra.mrb[0].mxu0 %vm52_vm0, %v173_v3 }
  0xdd   :  { %v168_v4 = vpop.f32.mrb[0].mxu0 }
  0xde   :  { %v93_v6 = vpop.f32.mrb[1].mxu0  ;;  %v102_v8 = vadd.f32 %v168_v4, %v132_v5 }
  0xdf   :  { %v169_v7 = vpop.f32.mrb[2].mxu0  ;;  %v94_v11 = vadd.f32 %v132_v5, %v93_v6 }
  0xe0   :  { %v105_v9 = vadd.f32 %v169_v7, %v132_v5  ;;  %v96_v10 = vpop.f32.mrb[3].mxu0 }
  0xe1   :  { %v97_v12 = vadd.f32 %v132_v5, %v96_v10 }
  0xe2   :  { %v155_v13 = vpack.c.bf16 %v105_v9, %v102_v8 }
  0xe3   :  { %v150_v14 = vpack.c.bf16 %v97_v12, %v94_v11 }
  0xe4   :  { %157 = vst [vmem:[%s218_s3 + $0x8] sm:$0xff] %v155_v13  }
  0xe5   :  { %151 = vst [vmem:[%s218_s3] sm:$0xff] %v150_v14  }

// kernel: rnn_model_forward.9
= control target key start
LH: loop header
LB: loop body
LE: loop exit
PB: predicated region body
PF: predicated region fallthrough
CT: control target
= control target key end

     0   :  { %vm53_vm0 = vcmask 261120   ;;  %s229_s0 = inlined_call_operand.vmem [shape: bf16[32,32], index: 0, kind: input, shape index: {}]   ;;  %s230_s1 = inlined_call_operand.vmem [shape: bf16[32,128], index: 1, kind: input, shape index: {}]   ;;  %s231_s2 = inlined_call_operand.vmem [shape: f32[1,128], index: 2, kind: input, shape index: {}]   ;;  %s232_s3 = inlined_call_operand.hbm [shape: f32[32,128], index: 3, kind: output, shape index: {}]  }
   0x1   :  { %v151_v0 = vld [vmem:[%s230_s1] sm:$0xff]   ;;  %v152_v1 = vld [vmem:[%s230_s1 + $0x8] sm:$0xff]  }
   0x2   :  { %140 = vmatprep.subr.bf16.mxu0 %v151_v0  ;;  %v153_v2 = vld [vmem:[%s229_s0] sm:$0xff]  }
   0x3   :  { %141 = vmatpush3.bf16.msra.mxu0 %v151_v0  ;;  %144 = vmatprep.mubr.msk.bf16.mxu0 %vm53_vm0, %v153_v2 }
   0x4   :  { %142 = vmatprep.subr.bf16.mxu0 %v152_v1 }
   0x5   :  { %8 = vsyncpa [#allocation3], 0  ;;  %v154_v3 = vld [vmem:[%s229_s0 + $0x8] sm:$0xff]   ;;  %v129_v4 = vld [vmem:[%s231_s2] ss:$0 sm:$0xff]  ;;  %s179_s1 = smov [#allocation2]  }
   0x6   :  { %s118_s22 = sshll.u32 %s179_s1, 4  ;;  %s119_s22 = int_to_ptr.vmem [resolvable:$true] %s118_s22 }
   0x7   :  { %143 = vmatpush3.bf16.msra.mxu0 %v152_v1  ;;  %s155_s0 = scalar_lea.vmem %s119_s22, 512  ;;  %p160_p1 = scmp.lt.s32.totalorder %s119_s22, %s119_s22 }
   0x8   :  { %p156_p0 = scmp.ne.s32.totalorder %s119_s22, %s155_s0  ;;  %p161_p2 = scmp.lt.s32.totalorder %s155_s0, %s155_s0 }
   0xa   :  { %145 = vmatmul.mubr.msk.bf16.vlgmr.msra.gmra.mrb[0].mxu0 %vm53_vm0, %v154_v3  ;;  %p162_p3 = por %p161_p2, %p160_p1 }
   0xc   :  { %p163_p4 = pnand %p162_p3, %p156_p0 }
  0xdd   :  { %v146_v5 = vpop.f32.mrb[0].mxu0 }
  0xde   :  { %v103_v6 = vadd.f32 %v146_v5, %v129_v4  ;;  %v94_v7 = vpop.f32.mrb[1].mxu0 }
  0xdf   :  { %v95_v8 = vadd.f32 %v129_v4, %v94_v7  ;;  %v147_v9 = vpop.f32.mrb[2].mxu0 }
  0xe0   :  { %111 = vst [vmem:[#allocation2 + $0x10] sm:$0xff] %v103_v6  ;;  %v106_v10 = vadd.f32 %v147_v9, %v129_v4  ;;  %v97_v11 = vpop.f32.mrb[3].mxu0 }
  0xe1   :  { %109 = vst [vmem:[#allocation2] sm:$0xff] %v95_v8  ;;  %v98_v12 = vadd.f32 %v129_v4, %v97_v11 }
  0xe2   :  { %112 = vst [vmem:[#allocation2 + $0x18] sm:$0xff] %v106_v10 }
  0xe3   :  { %110 = vst [vmem:[#allocation2 + $0x8] sm:$0xff] %v98_v12 }
  0xe4   :  { %166 = shalt.err (!%p163_p4)
}
  0xe5   :  { %s167_s24 = scalar_lea.hbm %s232_s3, 512 }
  0xe6   :  { %p168_p5 = scmp.ne.s32.totalorder %s232_s3, %s167_s24  ;;  %p171_p6 = scmp.lt.u32.totalorder %s167_s24, %s232_s3 }
  0xe8   :  { %p173_p7 = pnand %p171_p6, %p168_p5 }
  0xea   :  { %176 = shalt.err (!%p173_p7)
}
  0xeb   :  { %s180_s29 = smov 128   ;;  %s181_s30 = smov 8  }
  0xec   :  { %124 = dma.vmem_to_hbm [thread:$0]  %s119_s22, 512, %s232_s3, [#allocation3], %s180_s29, %s180_s29, %s181_s30  }
  0xed   :  { %177 = dma.done.wait [#allocation3], 512  }
  0xee   :  { %178 = vsyncadd [#allocation3], 4294966784 }
  0xef   :  { %128 = vsyncpa [#allocation3], 1 }

// kernel: rnn_model_forward.6
= control target key start
LH: loop header
LB: loop body
LE: loop exit
PB: predicated region body
PF: predicated region fallthrough
CT: control target
= control target key end

     0   :  { %v1000_v0 = vmov 0.0   ;;  %vm1001_vm0 = vmmov 0   ;;  %vm27_vm1 = vcmask 257024   ;;  %vm52_vm2 = vcmask 261120   ;;  %s1002_s29 = smov 64   ;;  %s1246_s3 = inlined_call_operand.vmem [shape: bf16[32,128], index: 3, kind: input, shape index: {}]   ;;  %s1247_s1 = inlined_call_operand.vmem [shape: f32[4,32], index: 1, kind: input, shape index: {}]   ;;  %s1248_s2 = inlined_call_operand.vmem [shape: f32[4,32], index: 2, kind: input, shape index: {}]   ;;  %s1249_s0 = inlined_call_operand.vmem [shape: bf16[8,4,128], index: 0, kind: input, shape index: {}]   ;;  %s1250_s4 = inlined_call_operand.vmem [shape: bf16[8,4,32], index: 4, kind: output, shape index: {0}]   ;;  %s1251_s5 = inlined_call_operand.vmem [shape: f32[4,32], index: 5, kind: output, shape index: {1}]   ;;  %s1252_s6 = inlined_call_operand.vmem [shape: f32[4,32], index: 6, kind: output, shape index: {2}]  }
   0x1   :  { %864 = vmatprep.subr.bf16.mxu0 %v1000_v0  ;;  %v1045_v1 = vld [vmem:[%s1246_s3] sm:$0xff]   ;;  %868 = vmatprep.mubr.msk.bf16.mxu0 %vm1001_vm0, %v1000_v0  ;;  %v1056_v2 = vld [vmem:[%s1246_s3 + $0x8] sm:$0xff]   ;;  %vm141_vm3 = vcmask 254976  }
   0x2   :  { %872 = vmatprep.subr.bf16.mxu1 %v1000_v0  ;;  %876 = vmatprep.mubr.msk.bf16.mxu1 %vm1001_vm0, %v1000_v0  ;;  %v26_v3 = vld [vmem:[%s1247_s1] sm:$0xf]  ;;  %v816_v61 = vld [vmem:[%s1249_s0 + $0x4] sm:$0x3] }
   0x3   :  { %865 = vmatpush3.bf16.msra.mxu0 %v1045_v1  ;;  %873 = vmatpush3.bf16.msra.mxu1 %v1045_v1  ;;  %28 = vst.msk [vmem:[#allocation2] sm:$0xf] %vm27_vm1, %v26_v3  ;;  %v29_v6 = vld [vmem:[%s1248_s2] sm:$0xf]  ;;  %s1003_s2 = smov 32   ;;  %v236_v62 = vunpack.c.l.bf16 %v816_v61 }
   0x4   :  { %866 = vmatprep.subr.bf16.mxu0 %v1000_v0  ;;  %874 = vmatprep.subr.bf16.mxu1 %v1000_v0  ;;  %30 = vst.msk [vmem:[#allocation3] sm:$0xf] %vm27_vm1, %v29_v6  ;;  %v37_v7 = vld [vmem:[%s1249_s0] sm:$0x3]  ;;  %v812_v35 = vld [vmem:[%s1249_s0 + $0x2] sm:$0x3] }
   0x5   :  { %v38_v8 = vunpack.c.l.bf16 %v37_v7  ;;  %v145_v36 = vunpack.c.l.bf16 %v812_v35 }
   0x7   :  { %867 = vmatpush3.bf16.msra.mxu0 %v1056_v2  ;;  %875 = vmatpush3.bf16.msra.mxu1 %v1056_v2 }
   0x8   :  { %880 = vmatprep.subr.bf16.mxu0 %v1000_v0  ;;  %888 = vmatprep.subr.bf16.mxu1 %v1000_v0 }
   0xa   :  { %v35_v4 = vld [vmem:[#allocation2] sm:$0xf] }
   0xb   :  { %v39_v5 = vpack.c.bf16 %v35_v4, %v35_v4  ;;  %v36_v17 = vld [vmem:[#allocation3] sm:$0xf] }
   0xd   :  { %869 = vmatmul.mubr.msk.bf16.vlgmr.msra.gmra.mrb[0].mxu0 %vm52_vm2, %v39_v5 }
   0xe   :  { %881 = vmatpush3.bf16.msra.mxu0 %v1045_v1  ;;  %884 = vmatprep.mubr.msk.bf16.mxu0 %vm1001_vm0, %v1000_v0 }
   0xf   :  { %882 = vmatprep.subr.bf16.mxu0 %v1000_v0 }
  0x12   :  { %883 = vmatpush3.bf16.msra.mxu0 %v1056_v2 }
  0x13   :  { %896 = vmatprep.subr.bf16.mxu0 %v1000_v0 }
  0xe0   :  { %v90_v9 = vpop.f32.mrb[0].mxu0 }
  0xe1   :  { %v96_v10 = vadd.f32 %v90_v9, %v38_v8  ;;  %v870_v11 = vpop.f32.mrb[1].mxu0 }
  0xe2   :  { %v93_v12 = vpop.f32.mrb[2].mxu0 }
  0xe3   :  { %v97_v13 = vpack.c.bf16 %v96_v10, %v96_v10  ;;  %v871_v14 = vpop.f32.mrb[3].mxu0 }
  0xe5   :  { %936 = vtanh.bf16 %v97_v13  ;;  %v811_v18 = vmul.bf16 3216621497, %v97_v13 }
  0xe7   :  { %938 = vpow.bf16 %v811_v18 }
  0xf0   :  { %v937_v15 = vpop.eup %936 }
  0xf1   :  { %v107_v16 = vunpack.c.l.bf16 %v937_v15 }
  0xf2   :  { %v939_v19 = vpop.eup %938 }
  0xf3   :  { %114 = vrot.lane.b32.xlu0 %v107_v16, %s1002_s29  ;;  %v102_v20 = vadd.bf16 1065369472, %v939_v19 }
  0xf5   :  { %940 = vrcp.bf16 %v102_v20 }
  0xf7   :  { %109 = vrot.lane.b32.xlu0 %v36_v17, %s1003_s2 }
 0x100   :  { %v941_v21 = vpop.eup %940 }
 0x101   :  { %v104_v22 = vmul.bf16 1065369472, %v941_v21 }
 0x103   :  { %v105_v23 = vunpack.c.l.bf16 %v104_v22 }
 0x165   :  { %v115_v24 = vpop.permute.xlu0 %114 }
 0x166   :  { %v117_v25 = vmul.f32 %v115_v24, %v105_v23 }
 0x168   :  { %119 = vrot.lane.b32.xlu1 %v117_v25, %s1003_s2 }
 0x169   :  { %v110_v26 = vpop.permute.xlu0 %109 }
 0x16a   :  { %v112_v27 = vmul.f32 %v110_v26, %v105_v23  ;;  %v820_v26 = vld [vmem:[%s1249_s0 + $0x6] sm:$0x3] }
 0x1da   :  { %v120_v28 = vpop.permute.xlu1 %119 }
 0x1db   :  { %v122_v29 = vadd.f32 %v120_v28, %v112_v27  ;;  %v327_v27 = vunpack.c.l.bf16 %v820_v26 }
 0x1dd   :  { %942 = vtanh.f32 %v122_v29 }
 0x1e7   :  { %v943_v30 = vpop.eup %942 }
 0x1e8   :  { %125 = vrot.lane.b32.xlu1 %v943_v30, %s1002_s29 }
 0x25a   :  { %v126_v31 = vpop.permute.xlu1 %125 }
 0x25b   :  { %v128_v32 = vmul.f32 %v126_v31, %v105_v23 }
 0x25d   :  { %v1087_v33 = vpack.c.bf16 %v128_v32, %v128_v32 }
 0x25f   :  { %146 = vrot.lane.b32.xlu0 %v1087_v33, %s1003_s2 }
 0x2d1   :  { %v147_v34 = vpop.permute.xlu0 %146 }
 0x2d2   :  { %877 = vmatmul.mubr.msk.bf16.vlgmr.msra.gmra.mrb[0].mxu1 %vm52_vm2, %v147_v34 }
 0x2d3   :  { %889 = vmatpush3.bf16.msra.mxu1 %v1045_v1  ;;  %892 = vmatprep.mubr.msk.bf16.mxu1 %vm1001_vm0, %v1000_v0 }
 0x2d4   :  { %890 = vmatprep.subr.bf16.mxu1 %v1000_v0 }
 0x2d7   :  { %891 = vmatpush3.bf16.msra.mxu1 %v1056_v2 }
 0x2d8   :  { %904 = vmatprep.subr.bf16.mxu1 %v1000_v0 }
 0x3a5   :  { %v185_v37 = vpop.f32.mrb[0].mxu1 }
 0x3a6   :  { %v191_v38 = vadd.f32 %v185_v37, %v145_v36  ;;  %v878_v39 = vpop.f32.mrb[1].mxu1 }
 0x3a7   :  { %v188_v40 = vpop.f32.mrb[2].mxu1 }
 0x3a8   :  { %v192_v41 = vpack.c.bf16 %v191_v38, %v191_v38  ;;  %v879_v42 = vpop.f32.mrb[3].mxu1 }
 0x3aa   :  { %944 = vtanh.bf16 %v192_v41  ;;  %v814_v45 = vmul.bf16 3216621497, %v192_v41 }
 0x3ac   :  { %946 = vpow.bf16 %v814_v45 }
 0x3b5   :  { %v945_v43 = vpop.eup %944 }
 0x3b6   :  { %v202_v44 = vunpack.c.l.bf16 %v945_v43 }
 0x3b7   :  { %v947_v46 = vpop.eup %946 }
 0x3b8   :  { %205 = vrot.lane.b32.xlu1 %v202_v44, %s1002_s29  ;;  %v197_v47 = vadd.bf16 1065369472, %v947_v46 }
 0x3ba   :  { %948 = vrcp.bf16 %v197_v47 }
 0x3c5   :  { %v949_v48 = vpop.eup %948 }
 0x3c6   :  { %v199_v49 = vmul.bf16 1065369472, %v949_v48 }
 0x3c8   :  { %v200_v50 = vunpack.c.l.bf16 %v199_v49 }
 0x3ca   :  { %v203_v53 = vmul.f32 %v200_v50, %v122_v29 }
 0x42a   :  { %v206_v51 = vpop.permute.xlu1 %205 }
 0x42b   :  { %v208_v52 = vmul.f32 %v206_v51, %v200_v50 }
 0x42d   :  { %210 = vrot.lane.b32.xlu0 %v208_v52, %s1003_s2 }
 0x49f   :  { %v211_v54 = vpop.permute.xlu0 %210 }
 0x4a0   :  { %v213_v55 = vadd.f32 %v211_v54, %v203_v53  ;;  %v824_v53 = vld [vmem:[%s1249_s0 + $0x8] sm:$0x3] }
 0x4a1   :  { %v418_v54 = vunpack.c.l.bf16 %v824_v53 }
 0x4a2   :  { %950 = vtanh.f32 %v213_v55 }
 0x4ac   :  { %v951_v56 = vpop.eup %950 }
 0x4ad   :  { %216 = vrot.lane.b32.xlu1 %v951_v56, %s1002_s29 }
 0x51f   :  { %v217_v57 = vpop.permute.xlu1 %216 }
 0x520   :  { %v219_v58 = vmul.f32 %v217_v57, %v200_v50 }
 0x522   :  { %v1104_v59 = vpack.c.bf16 %v219_v58, %v219_v58 }
 0x524   :  { %237 = vrot.lane.b32.xlu0 %v1104_v59, %s1003_s2 }
 0x596   :  { %v238_v60 = vpop.permute.xlu0 %237 }
 0x597   :  { %885 = vmatmul.mubr.msk.bf16.vlgmr.msra.gmra.mrb[4].mxu0 %vm52_vm2, %v238_v60 }
 0x598   :  { %897 = vmatpush3.bf16.msra.mxu0 %v1045_v1  ;;  %900 = vmatprep.mubr.msk.bf16.mxu0 %vm1001_vm0, %v1000_v0 }
 0x599   :  { %898 = vmatprep.subr.bf16.mxu0 %v1000_v0 }
 0x59c   :  { %899 = vmatpush3.bf16.msra.mxu0 %v1056_v2 }
 0x59d   :  { %912 = vmatprep.subr.bf16.mxu0 %v1000_v0 }
 0x66a   :  { %v276_v63 = vpop.f32.mrb[4].mxu0 }
 0x66b   :  { %v282_v3 = vadd.f32 %v276_v63, %v236_v62  ;;  %v886_v4 = vpop.f32.mrb[5].mxu0 }
 0x66c   :  { %v279_v5 = vpop.f32.mrb[6].mxu0 }
 0x66d   :  { %v283_v6 = vpack.c.bf16 %v282_v3, %v282_v3  ;;  %v887_v7 = vpop.f32.mrb[7].mxu0 }
 0x66f   :  { %952 = vtanh.bf16 %v283_v6  ;;  %v818_v10 = vmul.bf16 3216621497, %v283_v6 }
 0x671   :  { %954 = vpow.bf16 %v818_v10 }
 0x67a   :  { %v953_v8 = vpop.eup %952 }
 0x67b   :  { %v293_v9 = vunpack.c.l.bf16 %v953_v8 }
 0x67c   :  { %v955_v11 = vpop.eup %954 }
 0x67d   :  { %296 = vrot.lane.b32.xlu1 %v293_v9, %s1002_s29  ;;  %v288_v12 = vadd.bf16 1065369472, %v955_v11 }
 0x67f   :  { %956 = vrcp.bf16 %v288_v12 }
 0x68a   :  { %v957_v13 = vpop.eup %956 }
 0x68b   :  { %v290_v14 = vmul.bf16 1065369472, %v957_v13 }
 0x68d   :  { %v291_v15 = vunpack.c.l.bf16 %v290_v14 }
 0x68f   :  { %v294_v18 = vmul.f32 %v291_v15, %v213_v55 }
 0x6ef   :  { %v297_v16 = vpop.permute.xlu1 %296 }
 0x6f0   :  { %v299_v17 = vmul.f32 %v297_v16, %v291_v15 }
 0x6f2   :  { %301 = vrot.lane.b32.xlu0 %v299_v17, %s1003_s2 }
 0x764   :  { %v302_v19 = vpop.permute.xlu0 %301 }
 0x765   :  { %v304_v20 = vadd.f32 %v302_v19, %v294_v18  ;;  %v828_v19 = vld [vmem:[%s1249_s0 + $0xa] sm:$0x3] }
 0x767   :  { %958 = vtanh.f32 %v304_v20 }
 0x771   :  { %v959_v21 = vpop.eup %958 }
 0x772   :  { %307 = vrot.lane.b32.xlu1 %v959_v21, %s1002_s29 }
 0x7e4   :  { %v308_v22 = vpop.permute.xlu1 %307 }
 0x7e5   :  { %v310_v23 = vmul.f32 %v308_v22, %v291_v15 }
 0x7e7   :  { %v1121_v24 = vpack.c.bf16 %v310_v23, %v310_v23 }
 0x7e9   :  { %328 = vrot.lane.b32.xlu0 %v1121_v24, %s1003_s2 }
 0x85b   :  { %v329_v25 = vpop.permute.xlu0 %328 }
 0x85c   :  { %893 = vmatmul.mubr.msk.bf16.vlgmr.msra.gmra.mrb[4].mxu1 %vm52_vm2, %v329_v25 }
 0x85d   :  { %905 = vmatpush3.bf16.msra.mxu1 %v1045_v1  ;;  %908 = vmatprep.mubr.msk.bf16.mxu1 %vm1001_vm0, %v1000_v0 }
 0x85e   :  { %906 = vmatprep.subr.bf16.mxu1 %v1000_v0 }
 0x861   :  { %907 = vmatpush3.bf16.msra.mxu1 %v1056_v2 }
 0x862   :  { %920 = vmatprep.subr.bf16.mxu1 %v1000_v0 }
 0x92f   :  { %v367_v28 = vpop.f32.mrb[4].mxu1 }
 0x930   :  { %v373_v29 = vadd.f32 %v367_v28, %v327_v27  ;;  %v894_v30 = vpop.f32.mrb[5].mxu1 }
 0x931   :  { %v370_v31 = vpop.f32.mrb[6].mxu1 }
 0x932   :  { %v374_v32 = vpack.c.bf16 %v373_v29, %v373_v29  ;;  %v895_v34 = vpop.f32.mrb[7].mxu1 }
 0x934   :  { %960 = vtanh.bf16 %v374_v32  ;;  %v822_v37 = vmul.bf16 3216621497, %v374_v32 }
 0x936   :  { %962 = vpow.bf16 %v822_v37 }
 0x93f   :  { %v961_v35 = vpop.eup %960 }
 0x940   :  { %v384_v36 = vunpack.c.l.bf16 %v961_v35 }
 0x941   :  { %v963_v38 = vpop.eup %962 }
 0x942   :  { %387 = vrot.lane.b32.xlu1 %v384_v36, %s1002_s29  ;;  %v379_v39 = vadd.bf16 1065369472, %v963_v38 }
 0x944   :  { %964 = vrcp.bf16 %v379_v39 }
 0x94f   :  { %v965_v40 = vpop.eup %964 }
 0x950   :  { %v381_v41 = vmul.bf16 1065369472, %v965_v40 }
 0x952   :  { %v382_v42 = vunpack.c.l.bf16 %v381_v41 }
 0x954   :  { %v385_v45 = vmul.f32 %v382_v42, %v304_v20  ;;  %v509_v20 = vunpack.c.l.bf16 %v828_v19 }
 0x9b4   :  { %v388_v43 = vpop.permute.xlu1 %387 }
 0x9b5   :  { %v390_v44 = vmul.f32 %v388_v43, %v382_v42 }
 0x9b7   :  { %392 = vrot.lane.b32.xlu0 %v390_v44, %s1003_s2  ;;  %v832_v44 = vld [vmem:[%s1249_s0 + $0xc] sm:$0x3] }
 0xa29   :  { %v393_v46 = vpop.permute.xlu0 %392 }
 0xa2a   :  { %v395_v47 = vadd.f32 %v393_v46, %v385_v45  ;;  %v600_v45 = vunpack.c.l.bf16 %v832_v44 }
 0xa2c   :  { %966 = vtanh.f32 %v395_v47 }
 0xa36   :  { %v967_v48 = vpop.eup %966 }
 0xa37   :  { %398 = vrot.lane.b32.xlu1 %v967_v48, %s1002_s29 }
 0xaa9   :  { %v399_v49 = vpop.permute.xlu1 %398 }
 0xaaa   :  { %v401_v50 = vmul.f32 %v399_v49, %v382_v42 }
 0xaac   :  { %v1138_v51 = vpack.c.bf16 %v401_v50, %v401_v50 }
 0xaae   :  { %419 = vrot.lane.b32.xlu0 %v1138_v51, %s1003_s2 }
 0xb20   :  { %v420_v52 = vpop.permute.xlu0 %419 }
 0xb21   :  { %901 = vmatmul.mubr.msk.bf16.vlgmr.msra.gmra.mrb[8].mxu0 %vm52_vm2, %v420_v52 }
 0xb22   :  { %913 = vmatpush3.bf16.msra.mxu0 %v1045_v1  ;;  %916 = vmatprep.mubr.msk.bf16.mxu0 %vm1001_vm0, %v1000_v0 }
 0xb23   :  { %914 = vmatprep.subr.bf16.mxu0 %v1000_v0 }
 0xb26   :  { %915 = vmatpush3.bf16.msra.mxu0 %v1056_v2 }
 0xbf4   :  { %v458_v55 = vpop.f32.mrb[8].mxu0 }
 0xbf5   :  { %v464_v56 = vadd.f32 %v458_v55, %v418_v54  ;;  %v902_v57 = vpop.f32.mrb[9].mxu0 }
 0xbf6   :  { %v461_v58 = vpop.f32.mrb[10].mxu0 }
 0xbf7   :  { %v465_v60 = vpack.c.bf16 %v464_v56, %v464_v56  ;;  %v903_v61 = vpop.f32.mrb[11].mxu0 }
 0xbf9   :  { %968 = vtanh.bf16 %v465_v60  ;;  %v826_v3 = vmul.bf16 3216621497, %v465_v60 }
 0xbfb   :  { %970 = vpow.bf16 %v826_v3 }
 0xc04   :  { %v969_v62 = vpop.eup %968 }
 0xc05   :  { %v475_v63 = vunpack.c.l.bf16 %v969_v62 }
 0xc06   :  { %v971_v4 = vpop.eup %970 }
 0xc07   :  { %478 = vrot.lane.b32.xlu1 %v475_v63, %s1002_s29  ;;  %v470_v5 = vadd.bf16 1065369472, %v971_v4 }
 0xc09   :  { %972 = vrcp.bf16 %v470_v5 }
 0xc14   :  { %v973_v6 = vpop.eup %972 }
 0xc15   :  { %v472_v7 = vmul.bf16 1065369472, %v973_v6 }
 0xc17   :  { %v473_v8 = vunpack.c.l.bf16 %v472_v7 }
 0xc19   :  { %v476_v11 = vmul.f32 %v473_v8, %v395_v47 }
 0xc79   :  { %v479_v9 = vpop.permute.xlu1 %478 }
 0xc7a   :  { %v481_v10 = vmul.f32 %v479_v9, %v473_v8 }
 0xc7c   :  { %483 = vrot.lane.b32.xlu0 %v481_v10, %s1003_s2 }
 0xcee   :  { %v484_v12 = vpop.permute.xlu0 %483 }
 0xcef   :  { %v486_v13 = vadd.f32 %v484_v12, %v476_v11  ;;  %v836_v11 = vld [vmem:[%s1249_s0 + $0xe] sm:$0x3] }
 0xcf0   :  { %v691_v12 = vunpack.c.l.bf16 %v836_v11 }
 0xcf1   :  { %974 = vtanh.f32 %v486_v13 }
 0xcfb   :  { %v975_v14 = vpop.eup %974 }
 0xcfc   :  { %489 = vrot.lane.b32.xlu1 %v975_v14, %s1002_s29 }
 0xd6e   :  { %v490_v15 = vpop.permute.xlu1 %489 }
 0xd6f   :  { %v492_v16 = vmul.f32 %v490_v15, %v473_v8 }
 0xd71   :  { %v1154_v17 = vpack.c.bf16 %v492_v16, %v492_v16 }
 0xd73   :  { %510 = vrot.lane.b32.xlu0 %v1154_v17, %s1003_s2 }
 0xde5   :  { %v511_v18 = vpop.permute.xlu0 %510 }
 0xde6   :  { %909 = vmatmul.mubr.msk.bf16.vlgmr.msra.gmra.mrb[8].mxu1 %vm52_vm2, %v511_v18 }
 0xde7   :  { %921 = vmatpush3.bf16.msra.mxu1 %v1045_v1  ;;  %924 = vmatprep.mubr.msk.bf16.mxu1 %vm1001_vm0, %v1000_v0 }
 0xde8   :  { %922 = vmatprep.subr.bf16.mxu1 %v1000_v0 }
 0xdeb   :  { %923 = vmatpush3.bf16.msra.mxu1 %v1056_v2 }
 0xeb9   :  { %v549_v21 = vpop.f32.mrb[8].mxu1 }
 0xeba   :  { %v555_v22 = vadd.f32 %v549_v21, %v509_v20  ;;  %v910_v23 = vpop.f32.mrb[9].mxu1 }
 0xebb   :  { %v552_v25 = vpop.f32.mrb[10].mxu1 }
 0xebc   :  { %v556_v26 = vpack.c.bf16 %v555_v22, %v555_v22  ;;  %v911_v27 = vpop.f32.mrb[11].mxu1 }
 0xebd   :  { %v1004_v27 = vmov 1983009808  }
 0xebe   :  { %976 = vtanh.bf16 %v556_v26  ;;  %v830_v29 = vmul.bf16 3216621497, %v556_v26 }
 0xec0   :  { %978 = vpow.bf16 %v830_v29 }
 0xec9   :  { %v977_v1 = vpop.eup %976 }
 0xeca   :  { %v566_v28 = vunpack.c.l.bf16 %v977_v1  ;;  %v132_v1 = vunpack.c.l.s4 %v1004_v27 }
 0xecb   :  { %v979_v0 = vpop.eup %978 }
 0xecc   :  { %569 = vrot.lane.b32.xlu1 %v566_v28, %s1002_s29  ;;  %v561_v2 = vadd.bf16 1065369472, %v979_v0  ;;  %v134_v28 = vlaneseq  ;;  %v133_v0 = vunpack.c.0.s8 %v132_v1 }
 0xece   :  { %980 = vrcp.bf16 %v561_v2  ;;  %v135_v2 = vshrl.u32 %v134_v28, 7 }
 0xed9   :  { %v981_v30 = vpop.eup %980 }
 0xeda   :  { %v563_v31 = vmul.bf16 1065369472, %v981_v30 }
 0xedc   :  { %v564_v32 = vunpack.c.l.bf16 %v563_v31 }
 0xede   :  { %v567_v36 = vmul.f32 %v564_v32, %v486_v13 }
 0xf3e   :  { %v570_v34 = vpop.permute.xlu1 %569 }
 0xf3f   :  { %v572_v35 = vmul.f32 %v570_v34, %v564_v32 }
 0xf41   :  { %574 = vrot.lane.b32.xlu0 %v572_v35, %s1003_s2 }
 0xfb3   :  { %v575_v37 = vpop.permute.xlu0 %574 }
 0xfb4   :  { %v577_v38 = vadd.f32 %v575_v37, %v567_v36 }
 0xfb6   :  { %982 = vtanh.f32 %v577_v38 }
 0xfc0   :  { %v983_v39 = vpop.eup %982 }
 0xfc1   :  { %580 = vrot.lane.b32.xlu1 %v983_v39, %s1002_s29 }
0x1033   :  { %v581_v40 = vpop.permute.xlu1 %580 }
0x1034   :  { %v583_v41 = vmul.f32 %v581_v40, %v564_v32  ;;  %v136_v32 = vsub.s32 %v133_v0, %v135_v2 }
0x1036   :  { %v1170_v42 = vpack.c.bf16 %v583_v41, %v583_v41  ;;  %v137_v35 = vrot.slane %v1087_v33, %v136_v32  ;;  %v319_v36 = vrot.slane %v1121_v24, %v136_v32  ;;  %v501_v37 = vrot.slane %v1154_v17, %v136_v32 }
0x1037   :  { %v228_v44 = vrot.slane %v1104_v59, %v136_v32 }
0x1038   :  { %601 = vrot.lane.b32.xlu0 %v1170_v42, %s1003_s2 }
0x10aa   :  { %v602_v43 = vpop.permute.xlu0 %601 }
0x10ab   :  { %917 = vmatmul.mubr.msk.bf16.vlgmr.msra.gmra.mrb[12].mxu0 %vm52_vm2, %v602_v43 }
0x117e   :  { %v640_v46 = vpop.f32.mrb[12].mxu0 }
0x117f   :  { %v646_v47 = vadd.f32 %v640_v46, %v600_v45  ;;  %v918_v48 = vpop.f32.mrb[13].mxu0  ;;  %v410_v46 = vrot.slane %v1138_v51, %v136_v32 }
0x1180   :  { %v643_v49 = vpop.f32.mrb[14].mxu0 }
0x1181   :  { %v647_v50 = vpack.c.bf16 %v646_v47, %v646_v47  ;;  %v919_v52 = vpop.f32.mrb[15].mxu0  ;;  %v592_v47 = vrot.slane %v1170_v42, %v136_v32 }
0x1183   :  { %984 = vtanh.bf16 %v647_v50  ;;  %v834_v55 = vmul.bf16 3216621497, %v647_v50 }
0x1185   :  { %986 = vpow.bf16 %v834_v55 }
0x118e   :  { %v985_v53 = vpop.eup %984 }
0x118f   :  { %v657_v54 = vunpack.c.l.bf16 %v985_v53 }
0x1190   :  { %v987_v56 = vpop.eup %986 }
0x1191   :  { %660 = vrot.lane.b32.xlu1 %v657_v54, %s1002_s29  ;;  %v652_v57 = vadd.bf16 1065369472, %v987_v56 }
0x1193   :  { %988 = vrcp.bf16 %v652_v57 }
0x119e   :  { %v989_v58 = vpop.eup %988 }
0x119f   :  { %v654_v60 = vmul.bf16 1065369472, %v989_v58 }
0x11a1   :  { %v655_v61 = vunpack.c.l.bf16 %v654_v60 }
0x11a3   :  { %v658_v3 = vmul.f32 %v655_v61, %v577_v38 }
0x1203   :  { %v661_v62 = vpop.permute.xlu1 %660 }
0x1204   :  { %v663_v63 = vmul.f32 %v661_v62, %v655_v61 }
0x1206   :  { %665 = vrot.lane.b32.xlu0 %v663_v63, %s1003_s2 }
0x1278   :  { %v666_v4 = vpop.permute.xlu0 %665 }
0x1279   :  { %v668_v5 = vadd.f32 %v666_v4, %v658_v3 }
0x127b   :  { %990 = vtanh.f32 %v668_v5 }
0x1285   :  { %v991_v6 = vpop.eup %990 }
0x1286   :  { %671 = vrot.lane.b32.xlu1 %v991_v6, %s1002_s29 }
0x12f8   :  { %v672_v7 = vpop.permute.xlu1 %671 }
0x12f9   :  { %v674_v8 = vmul.f32 %v672_v7, %v655_v61 }
0x12fb   :  { %v675_v9 = vpack.c.bf16 %v674_v8, %v674_v8 }
0x12fd   :  { %692 = vrot.lane.b32.xlu0 %v675_v9, %s1003_s2  ;;  %v683_v38 = vrot.slane %v675_v9, %v136_v32 }
0x136f   :  { %v693_v10 = vpop.permute.xlu0 %692 }
0x1370   :  { %925 = vmatmul.mubr.msk.bf16.vlgmr.msra.gmra.mrb[12].mxu1 %vm52_vm2, %v693_v10 }
0x1443   :  { %v731_v13 = vpop.f32.mrb[12].mxu1 }
0x1444   :  { %v737_v14 = vadd.f32 %v731_v13, %v691_v12  ;;  %v926_v15 = vpop.f32.mrb[13].mxu1 }
0x1445   :  { %v734_v16 = vpop.f32.mrb[14].mxu1 }
0x1446   :  { %v738_v18 = vpack.c.bf16 %v737_v14, %v737_v14  ;;  %v927_v19 = vpop.f32.mrb[15].mxu1 }
0x1448   :  { %992 = vtanh.bf16 %v738_v18  ;;  %v838_v22 = vmul.bf16 3216621497, %v738_v18 }
0x144a   :  { %994 = vpow.bf16 %v838_v22 }
0x1453   :  { %v993_v20 = vpop.eup %992 }
0x1454   :  { %v748_v21 = vunpack.c.l.bf16 %v993_v20 }
0x1455   :  { %v995_v23 = vpop.eup %994 }
0x1456   :  { %751 = vrot.lane.b32.xlu1 %v748_v21, %s1002_s29  ;;  %v743_v25 = vadd.bf16 1065369472, %v995_v23 }
0x1458   :  { %996 = vrcp.bf16 %v743_v25 }
0x1463   :  { %v997_v26 = vpop.eup %996 }
0x1464   :  { %v745_v29 = vmul.bf16 1065369472, %v997_v26 }
0x1466   :  { %v746_v30 = vunpack.c.l.bf16 %v745_v29 }
0x1468   :  { %v749_v39 = vmul.f32 %v746_v30, %v668_v5 }
0x14c8   :  { %v752_v31 = vpop.permute.xlu1 %751 }
0x14c9   :  { %v754_v34 = vmul.f32 %v752_v31, %v746_v30 }
0x14cb   :  { %756 = vrot.lane.b32.xlu0 %v754_v34, %s1003_s2 }
0x14cf   :  { %138 = vrot.lane.b32.xlu0 %v137_v35, %s1003_s2 }
0x14d3   :  { %320 = vrot.lane.b32.xlu0 %v319_v36, %s1003_s2 }
0x14d7   :  { %502 = vrot.lane.b32.xlu0 %v501_v37, %s1003_s2 }
0x14db   :  { %684 = vrot.lane.b32.xlu0 %v683_v38, %s1003_s2 }
0x153d   :  { %v757_v40 = vpop.permute.xlu0 %756 }
0x153e   :  { %v759_v41 = vadd.f32 %v757_v40, %v749_v39 }
0x1540   :  { %998 = vtanh.f32 %v759_v41 }
0x1541   :  { %v139_v43 = vpop.permute.xlu0 %138 }
0x1542   :  { %142 = vst.msk [vmem:[%s1250_s4] sm:$0x3] %vm141_vm3, %v139_v43 }
0x1545   :  { %v321_v33 = vpop.permute.xlu0 %320 }
0x1546   :  { %819 = vst.msk [vmem:[%s1250_s4 + $0x4] sm:$0x3] %vm141_vm3, %v321_v33 }
0x1549   :  { %v503_v24 = vpop.permute.xlu0 %502 }
0x154a   :  { %v999_v17 = vpop.eup %998  ;;  %827 = vst.msk [vmem:[%s1250_s4 + $0x8] sm:$0x3] %vm141_vm3, %v503_v24 }
0x154b   :  { %762 = vrot.lane.b32.xlu1 %v999_v17, %s1002_s29  ;;  %s1005_s29 = smov 96  }
0x154d   :  { %v685_v45 = vpop.permute.xlu0 %684 }
0x154e   :  { %835 = vst.msk [vmem:[%s1250_s4 + $0xc] sm:$0x3] %vm141_vm3, %v685_v45 }
0x154f   :  { %229 = vrot.lane.b32.xlu1 %v228_v44, %s1003_s2 }
0x1553   :  { %411 = vrot.lane.b32.xlu1 %v410_v46, %s1003_s2 }
0x1557   :  { %593 = vrot.lane.b32.xlu1 %v592_v47, %s1003_s2 }
0x15bd   :  { %v763_v48 = vpop.permute.xlu1 %762 }
0x15be   :  { %v765_v49 = vmul.f32 %v763_v48, %v746_v30 }
0x15c0   :  { %v766_v50 = vpack.c.bf16 %v765_v49, %v765_v49  ;;  %781 = vrot.lane.b32.xlu0 %v765_v49, %s1003_s2 }
0x15c1   :  { %v230_v59 = vpop.permute.xlu1 %229 }
0x15c2   :  { %815 = vst.msk [vmem:[%s1250_s4 + $0x2] sm:$0x3] %vm141_vm3, %v230_v59  ;;  %v774_v52 = vrot.slane %v766_v50, %v136_v32 }
0x15c4   :  { %775 = vrot.lane.b32.xlu1 %v774_v52, %s1003_s2 }
0x15c5   :  { %v412_v51 = vpop.permute.xlu1 %411 }
0x15c6   :  { %823 = vst.msk [vmem:[%s1250_s4 + $0x6] sm:$0x3] %vm141_vm3, %v412_v51 }
0x15c8   :  { %787 = vrot.lane.b32.xlu1 %v759_v41, %s1005_s29 }
0x15c9   :  { %v594_v42 = vpop.permute.xlu1 %593 }
0x15ca   :  { %831 = vst.msk [vmem:[%s1250_s4 + $0xa] sm:$0x3] %vm141_vm3, %v594_v42 }
0x1632   :  { %v782_v53 = vpop.permute.xlu0 %781 }
0x1633   :  { %785 = vst.msk [vmem:[#allocation2] sm:$0xf] %vm27_vm1, %v782_v53  ;;  %794 = vst.msk [vmem:[%s1251_s5] sm:$0xf] %vm27_vm1, %v782_v53 }
0x1636   :  { %v776_v54 = vpop.permute.xlu1 %775 }
0x1637   :  { %839 = vst.msk [vmem:[%s1250_s4 + $0xe] sm:$0x3] %vm141_vm3, %v776_v54 }
0x163a   :  { %v788_v55 = vpop.permute.xlu1 %787 }
0x163b   :  { %790 = vst.msk [vmem:[#allocation3] sm:$0xf] %vm27_vm1, %v788_v55  ;;  %795 = vst.msk [vmem:[%s1252_s6] sm:$0xf] %vm27_vm1, %v788_v55 }

</bundles_post_ra>
